<compile_context>
chip_gen: v7x
topology: tpu7x:2x2x1
jax: 0.10.0
libtpu: 0.0.40
codegen_flags: <defaults>
</compile_context>

<pallas_src>
import jax
import jax.numpy as jnp
from jax.experimental import pallas as pl
from jax.experimental.pallas import tpu as pltpu


NEG_SLOPE = 0.01            # nn.LeakyReLU default negative_slope
_LANE = 128
_BF16_SUBLANE = 16          # bf16 sublane tiling: (16, 128)
_BATCH_TILE_CAP = 512


def _round_up(n, m):
    return (n + m - 1) // m * m


def _leaky_relu(x):
    # LeakyReLU with slope < 1 is exactly max(x, a*x): mul + max (2 VPU ops).
    return jnp.maximum(x, NEG_SLOPE * x)


def mlp_kernel(x_ref,
               w0_ref, b0_ref,
               w1_ref, b1_ref,
               w2_ref, b2_ref,
               w3_ref, b3_ref,
               w4_ref, b4_ref,
               o_ref):
    """Fully fused MLP forward for one batch tile.

    x_ref:  (TB, 384) bf16  (feature dim zero-padded 326 -> 384, cast in wrapper)
    wK_ref: bf16 [in, out] for the 4 hidden layers (grid-invariant).
    bK_ref: f32 (1, out) biases.
    w4_ref: f32 (1, 128) final-layer weight row; b4_ref: f32 (1, 1).
    Dropout layers are identity in eval mode (inference semantics).
    """
    # TODO(synk): training-mode dropout (Bernoulli masking) not implemented.
    h = x_ref[...]  # (TB, 384) bf16

    # Four hidden layers: bf16 operands on the MXU, f32 accumulation,
    # bias + LeakyReLU in f32 on the VPU.  Layer 0's astype is a no-op
    # (h is already bf16); layers 1-3 cast the f32 activations back to bf16.
    for w_ref, b_ref in ((w0_ref, b0_ref), (w1_ref, b1_ref),
                         (w2_ref, b2_ref), (w3_ref, b3_ref)):
        h = jnp.dot(h.astype(jnp.bfloat16), w_ref[...],
                    preferred_element_type=jnp.float32) + b_ref[...]
        h = _leaky_relu(h)

    # Final 128 -> 1 layer as a lane reduction (keeps the MXU out of an N=1
    # matmul; the (TB, 1) store is tiny).
    out = jnp.sum(h * w4_ref[...], axis=-1, keepdims=True) + b4_ref[...]
    o_ref[...] = out.astype(o_ref.dtype)


def prepare_params(params):
    """Layout/dtype-prepare the f32 [in, out] weights for the kernel.

    - pad layer-0 input dim 326 -> 384 (multiple of 128) with zero rows,
    - cast the four hidden-layer weights to bfloat16 (biases stay f32),
    - store the final (128, 1) weight column as an f32 (1, 128) row.
    """
    (w0, b0), (w1, b1), (w2, b2), (w3, b3), (w4, b4) = params
    k_pad = _round_up(w0.shape[0], _LANE)
    w0 = jnp.pad(w0, ((0, k_pad - w0.shape[0]), (0, 0)))
    prepared = [(w.astype(jnp.bfloat16), b.reshape(1, -1).astype(jnp.float32))
                for w, b in ((w0, b0), (w1, b1), (w2, b2), (w3, b3))]
    w4_row = w4.reshape(1, -1).astype(jnp.float32)   # (1, 128)
    b4 = b4.reshape(1, 1).astype(jnp.float32)        # (1, 1)
    prepared.append((w4_row, b4))
    return prepared


def _pick_batch_tile(B, batch_tile):
    if batch_tile is None:
        # One MXU-saturating tile; collapses to a single block for small B.
        batch_tile = min(_round_up(B, _BF16_SUBLANE), _BATCH_TILE_CAP)
    # bf16 x requires the sublane dim (batch) to be a multiple of 16.
    batch_tile = max(_BF16_SUBLANE, _round_up(int(batch_tile), _BF16_SUBLANE))
    return batch_tile


def mlp_forward(x, prepared, *, batch_tile=None):
    """Run the fused MLP forward pass with Pallas.

    x: [B, 326] float32
    prepared: output of prepare_params().
    """
    (w0, _), *_ = prepared
    B, f_in = x.shape
    k_pad = w0.shape[0]                      # 384

    batch_tile = _pick_batch_tile(B, batch_tile)
    b_pad = _round_up(B, batch_tile)
    grid = (b_pad // batch_tile,)
    # Note (v7x): at large B the 512-row tiles give a multi-step grid whose
    # "parallel" batch axis shards across both TensorCores; for B=16 the
    # single-step grid is weight-DMA-bound anyway.

    # Pad + cast x to bf16 in the wrapper: halves the only per-step growing
    # HBM stream and removes the per-step layer-0 cast inside the kernel.
    x_pad = jnp.pad(x, ((0, b_pad - B), (0, k_pad - f_in))).astype(jnp.bfloat16)

    def const_spec(arr):
        # Grid-invariant operand (weights/biases): constant index_map, DMA'd
        # once and kept resident in VMEM across grid steps.
        return pl.BlockSpec(arr.shape, lambda i: (0, 0))

    in_specs = [pl.BlockSpec((batch_tile, k_pad), lambda i: (i, 0))]
    flat_args = [x_pad]
    for w, b in prepared:
        in_specs += [const_spec(w), const_spec(b)]
        flat_args += [w, b]

    out_spec = pl.BlockSpec((batch_tile, 1), lambda i: (i, 0))

    # Advisory cost estimate: HBM-bound at small B.
    flops = 0
    for w, _ in prepared[:-1]:
        flops += 2 * b_pad * w.shape[0] * w.shape[1]
    flops += 2 * b_pad * prepared[-1][0].size
    bytes_accessed = sum(int(a.size) * a.dtype.itemsize for a in flat_args)
    bytes_accessed += b_pad * 4  # f32 output

    out = pl.pallas_call(
        mlp_kernel,
        out_shape=jax.ShapeDtypeStruct((b_pad, 1), jnp.float32),
        grid_spec=pltpu.PrefetchScalarGridSpec(
            num_scalar_prefetch=0,
            grid=grid,
            in_specs=in_specs,
            out_specs=out_spec,
        ),
        compiler_params=pltpu.CompilerParams(
            dimension_semantics=("parallel",),
        ),
        cost_estimate=pl.CostEstimate(
            flops=int(flops),
            transcendentals=0,
            bytes_accessed=int(bytes_accessed),
        ),
    )(*flat_args)
    return out[:B]


def init_params(key, max_width=1024):
    """Deterministic parameter init matching the PyTorch module's shapes."""
    dims = [326, max_width, max_width // 2, max_width // 4, max_width // 8, 1]
    params = []
    for li in range(len(dims) - 1):
        key, kw, kb = jax.random.split(key, 3)
        fan_in, fan_out = dims[li], dims[li + 1]
        scale = 1.0 / jnp.sqrt(jnp.float32(fan_in))
        w = jax.random.uniform(kw, (fan_in, fan_out), jnp.float32, -scale, scale)
        b = jax.random.uniform(kb, (1, fan_out), jnp.float32, -scale, scale)
        params.append((w, b))
    return params


def reference_forward_mixed(x, prepared):
    """Pure-JAX reference mirroring the kernel's bf16/f32 mixed precision."""
    hidden, (w4_row, b4) = prepared[:-1], prepared[-1]
    k_pad = prepared[0][0].shape[0]
    h = jnp.pad(x, ((0, 0), (0, k_pad - x.shape[1]))).astype(jnp.bfloat16)
    for w, b in hidden:
        h = jnp.dot(h.astype(jnp.bfloat16), w,
                    preferred_element_type=jnp.float32) + b
        h = _leaky_relu(h)
    return jnp.sum(h * w4_row, axis=-1, keepdims=True) + b4


def reference_forward_f32(x, params):
    """Pure-f32 reference matching the original PyTorch eval-mode forward."""
    h = x
    for w, b in params[:-1]:
        h = _leaky_relu(jnp.dot(h, w) + b)
    w4, b4 = params[-1]
    return jnp.dot(h, w4) + b4.reshape(1, -1)


if __name__ == "__main__":
    key = jax.random.PRNGKey(0)
    key, kx = jax.random.split(key)

    B, F_in = 16, 326
    x = jax.random.normal(kx, (B, F_in), dtype=jnp.float32)

    params = init_params(key, max_width=1024)
    prepared = prepare_params(params)

    out = mlp_forward(x, prepared)
    out = jax.block_until_ready(out)
    assert out.shape == (B, 1), out.shape

    # Tight check against the same mixed-precision path.
    ref_mixed = reference_forward_mixed(x, prepared)
    assert jnp.allclose(out, ref_mixed, atol=2e-2, rtol=2e-2), (
        float(jnp.max(jnp.abs(out - ref_mixed))))

    # Looser drift check against the true f32 model.
    ref_f32 = reference_forward_f32(x, params)
    assert jnp.allclose(out, ref_f32, atol=1e-1, rtol=1e-1), (
        float(jnp.max(jnp.abs(out - ref_f32))))

    print("KERNEL_OK")
</pallas_src>

<mosaic_0001>
module attributes {stable_mosaic.version = 11 : i64} {
  func.func @mlp_kernel(%arg0: i32, %arg1: memref<16x384xbf16, #tpu.memory_space<vmem>>, %arg2: memref<384x1024xbf16, #tpu.memory_space<vmem>>, %arg3: memref<1x1024xf32, #tpu.memory_space<vmem>>, %arg4: memref<1024x512xbf16, #tpu.memory_space<vmem>>, %arg5: memref<1x512xf32, #tpu.memory_space<vmem>>, %arg6: memref<512x256xbf16, #tpu.memory_space<vmem>>, %arg7: memref<1x256xf32, #tpu.memory_space<vmem>>, %arg8: memref<256x128xbf16, #tpu.memory_space<vmem>>, %arg9: memref<1x128xf32, #tpu.memory_space<vmem>>, %arg10: memref<1x128xf32, #tpu.memory_space<vmem>>, %arg11: memref<1x1xf32, #tpu.memory_space<vmem>>, %arg12: memref<16x1xf32, #tpu.memory_space<vmem>>) attributes {dimension_semantics = [#tpu.dimension_semantics<parallel>], iteration_bounds = array<i64: 1>, scalar_prefetch = 0 : i64, scratch_operands = 0 : i64, tpu.core_type = #tpu.core_type<tc>, window_params = [{transform_indices = @transform_0, window_bounds = array<i64: 16, 384>}, {pipeline_mode = #tpu.pipeline_mode<synchronous>, transform_indices = @transform_1, window_bounds = array<i64: 384, 1024>}, {pipeline_mode = #tpu.pipeline_mode<synchronous>, transform_indices = @transform_2, window_bounds = array<i64: 1, 1024>}, {pipeline_mode = #tpu.pipeline_mode<synchronous>, transform_indices = @transform_3, window_bounds = array<i64: 1024, 512>}, {pipeline_mode = #tpu.pipeline_mode<synchronous>, transform_indices = @transform_4, window_bounds = array<i64: 1, 512>}, {pipeline_mode = #tpu.pipeline_mode<synchronous>, transform_indices = @transform_5, window_bounds = array<i64: 512, 256>}, {pipeline_mode = #tpu.pipeline_mode<synchronous>, transform_indices = @transform_6, window_bounds = array<i64: 1, 256>}, {pipeline_mode = #tpu.pipeline_mode<synchronous>, transform_indices = @transform_7, window_bounds = array<i64: 256, 128>}, {pipeline_mode = #tpu.pipeline_mode<synchronous>, transform_indices = @transform_8, window_bounds = array<i64: 1, 128>}, {pipeline_mode = #tpu.pipeline_mode<synchronous>, transform_indices = @transform_9, window_bounds = array<i64: 1, 128>}, {pipeline_mode = #tpu.pipeline_mode<synchronous>, transform_indices = @transform_10, window_bounds = array<i64: 1, 1>}, {transform_indices = @transform_11, window_bounds = array<i64: 16, 1>}]} {
    %c0 = arith.constant 0 : index
    %c0_0 = arith.constant 0 : index
    %0 = vector.load %arg1[%c0, %c0_0] : memref<16x384xbf16, #tpu.memory_space<vmem>>, vector<16x384xbf16>
    %c0_1 = arith.constant 0 : index
    %c0_2 = arith.constant 0 : index
    %1 = vector.load %arg2[%c0_1, %c0_2] : memref<384x1024xbf16, #tpu.memory_space<vmem>>, vector<384x1024xbf16>
    %cst = arith.constant dense<0.000000e+00> : vector<16x1024xf32>
    %2 = tpu.matmul %0, %1, %cst {dimension_numbers = #tpu.dot_dimension_numbers<[1], [0], [0], [1], [0, 0, 1, 1], [], []>} : vector<16x384xbf16>, vector<384x1024xbf16>, vector<16x1024xf32> -> vector<16x1024xf32>
    %c0_3 = arith.constant 0 : index
    %c0_4 = arith.constant 0 : index
    %3 = vector.load %arg3[%c0_3, %c0_4] : memref<1x1024xf32, #tpu.memory_space<vmem>>, vector<1x1024xf32>
    %4 = vector.broadcast %3 : vector<1x1024xf32> to vector<16x1024xf32>
    %5 = arith.addf %2, %4 : vector<16x1024xf32>
    %cst_5 = arith.constant 0.00999999977 : f32
    %6 = vector.broadcast %cst_5 : f32 to vector<16x1024xf32>
    %7 = arith.mulf %6, %5 : vector<16x1024xf32>
    %8 = arith.maximumf %5, %7 : vector<16x1024xf32>
    %9 = arith.truncf %8 : vector<16x1024xf32> to vector<16x1024xbf16>
    %c0_6 = arith.constant 0 : index
    %c0_7 = arith.constant 0 : index
    %10 = vector.load %arg4[%c0_6, %c0_7] : memref<1024x512xbf16, #tpu.memory_space<vmem>>, vector<1024x512xbf16>
    %cst_8 = arith.constant dense<0.000000e+00> : vector<16x512xf32>
    %11 = tpu.matmul %9, %10, %cst_8 {dimension_numbers = #tpu.dot_dimension_numbers<[1], [0], [0], [1], [0, 0, 1, 1], [], []>} : vector<16x1024xbf16>, vector<1024x512xbf16>, vector<16x512xf32> -> vector<16x512xf32>
    %c0_9 = arith.constant 0 : index
    %c0_10 = arith.constant 0 : index
    %12 = vector.load %arg5[%c0_9, %c0_10] : memref<1x512xf32, #tpu.memory_space<vmem>>, vector<1x512xf32>
    %13 = vector.broadcast %12 : vector<1x512xf32> to vector<16x512xf32>
    %14 = arith.addf %11, %13 : vector<16x512xf32>
    %cst_11 = arith.constant 0.00999999977 : f32
    %15 = vector.broadcast %cst_11 : f32 to vector<16x512xf32>
    %16 = arith.mulf %15, %14 : vector<16x512xf32>
    %17 = arith.maximumf %14, %16 : vector<16x512xf32>
    %18 = arith.truncf %17 : vector<16x512xf32> to vector<16x512xbf16>
    %c0_12 = arith.constant 0 : index
    %c0_13 = arith.constant 0 : index
    %19 = vector.load %arg6[%c0_12, %c0_13] : memref<512x256xbf16, #tpu.memory_space<vmem>>, vector<512x256xbf16>
    %cst_14 = arith.constant dense<0.000000e+00> : vector<16x256xf32>
    %20 = tpu.matmul %18, %19, %cst_14 {dimension_numbers = #tpu.dot_dimension_numbers<[1], [0], [0], [1], [0, 0, 1, 1], [], []>} : vector<16x512xbf16>, vector<512x256xbf16>, vector<16x256xf32> -> vector<16x256xf32>
    %c0_15 = arith.constant 0 : index
    %c0_16 = arith.constant 0 : index
    %21 = vector.load %arg7[%c0_15, %c0_16] : memref<1x256xf32, #tpu.memory_space<vmem>>, vector<1x256xf32>
    %22 = vector.broadcast %21 : vector<1x256xf32> to vector<16x256xf32>
    %23 = arith.addf %20, %22 : vector<16x256xf32>
    %cst_17 = arith.constant 0.00999999977 : f32
    %24 = vector.broadcast %cst_17 : f32 to vector<16x256xf32>
    %25 = arith.mulf %24, %23 : vector<16x256xf32>
    %26 = arith.maximumf %23, %25 : vector<16x256xf32>
    %27 = arith.truncf %26 : vector<16x256xf32> to vector<16x256xbf16>
    %c0_18 = arith.constant 0 : index
    %c0_19 = arith.constant 0 : index
    %28 = vector.load %arg8[%c0_18, %c0_19] : memref<256x128xbf16, #tpu.memory_space<vmem>>, vector<256x128xbf16>
    %cst_20 = arith.constant dense<0.000000e+00> : vector<16x128xf32>
    %29 = tpu.matmul %27, %28, %cst_20 {dimension_numbers = #tpu.dot_dimension_numbers<[1], [0], [0], [1], [0, 0, 1, 1], [], []>} : vector<16x256xbf16>, vector<256x128xbf16>, vector<16x128xf32> -> vector<16x128xf32>
    %c0_21 = arith.constant 0 : index
    %c0_22 = arith.constant 0 : index
    %30 = vector.load %arg9[%c0_21, %c0_22] : memref<1x128xf32, #tpu.memory_space<vmem>>, vector<1x128xf32>
    %31 = vector.broadcast %30 : vector<1x128xf32> to vector<16x128xf32>
    %32 = arith.addf %29, %31 : vector<16x128xf32>
    %cst_23 = arith.constant 0.00999999977 : f32
    %33 = vector.broadcast %cst_23 : f32 to vector<16x128xf32>
    %34 = arith.mulf %33, %32 : vector<16x128xf32>
    %35 = arith.maximumf %32, %34 : vector<16x128xf32>
    %c0_24 = arith.constant 0 : index
    %c0_25 = arith.constant 0 : index
    %36 = vector.load %arg10[%c0_24, %c0_25] : memref<1x128xf32, #tpu.memory_space<vmem>>, vector<1x128xf32>
    %37 = vector.broadcast %36 : vector<1x128xf32> to vector<16x128xf32>
    %38 = arith.mulf %35, %37 : vector<16x128xf32>
    %cst_26 = arith.constant dense<0.000000e+00> : vector<16xf32>
    %39 = vector.multi_reduction <add>, %38, %cst_26 [1] : vector<16x128xf32> to vector<16xf32>
    %40 = vector.shape_cast %39 : vector<16xf32> to vector<16x1xf32>
    %c0_27 = arith.constant 0 : index
    %c0_28 = arith.constant 0 : index
    %41 = vector.load %arg11[%c0_27, %c0_28] : memref<1x1xf32, #tpu.memory_space<vmem>>, vector<1x1xf32>
    %42 = vector.broadcast %41 : vector<1x1xf32> to vector<16x1xf32>
    %43 = arith.addf %40, %42 : vector<16x1xf32>
    %c0_29 = arith.constant 0 : index
    %c0_30 = arith.constant 0 : index
    %44 = vector.load %arg12[%c0_29, %c0_30] : memref<16x1xf32, #tpu.memory_space<vmem>>, vector<16x1xf32>
    tpu.vector_store %arg12[%c0_29, %c0_30], %43 {strides = array<i32>} : memref<16x1xf32, #tpu.memory_space<vmem>>, vector<16x1xf32>,
    return
  }
  func.func @transform_0(%arg0: i32) -> (i32, i32) {
    %c0_i32 = arith.constant 0 : i32
    %c0_i32_0 = arith.constant 0 : i32
    return %arg0, %c0_i32 : i32, i32
  }
  func.func @transform_1(%arg0: i32) -> (i32, i32) {
    %c0_i32 = arith.constant 0 : i32
    %c0_i32_0 = arith.constant 0 : i32
    %c0_i32_1 = arith.constant 0 : i32
    return %c0_i32, %c0_i32_0 : i32, i32
  }
  func.func @transform_2(%arg0: i32) -> (i32, i32) {
    %c0_i32 = arith.constant 0 : i32
    %c0_i32_0 = arith.constant 0 : i32
    %c0_i32_1 = arith.constant 0 : i32
    return %c0_i32, %c0_i32_0 : i32, i32
  }
  func.func @transform_3(%arg0: i32) -> (i32, i32) {
    %c0_i32 = arith.constant 0 : i32
    %c0_i32_0 = arith.constant 0 : i32
    %c0_i32_1 = arith.constant 0 : i32
    return %c0_i32, %c0_i32_0 : i32, i32
  }
  func.func @transform_4(%arg0: i32) -> (i32, i32) {
    %c0_i32 = arith.constant 0 : i32
    %c0_i32_0 = arith.constant 0 : i32
    %c0_i32_1 = arith.constant 0 : i32
    return %c0_i32, %c0_i32_0 : i32, i32
  }
  func.func @transform_5(%arg0: i32) -> (i32, i32) {
    %c0_i32 = arith.constant 0 : i32
    %c0_i32_0 = arith.constant 0 : i32
    %c0_i32_1 = arith.constant 0 : i32
    return %c0_i32, %c0_i32_0 : i32, i32
  }
  func.func @transform_6(%arg0: i32) -> (i32, i32) {
    %c0_i32 = arith.constant 0 : i32
    %c0_i32_0 = arith.constant 0 : i32
    %c0_i32_1 = arith.constant 0 : i32
    return %c0_i32, %c0_i32_0 : i32, i32
  }
  func.func @transform_7(%arg0: i32) -> (i32, i32) {
    %c0_i32 = arith.constant 0 : i32
    %c0_i32_0 = arith.constant 0 : i32
    %c0_i32_1 = arith.constant 0 : i32
    return %c0_i32, %c0_i32_0 : i32, i32
  }
  func.func @transform_8(%arg0: i32) -> (i32, i32) {
    %c0_i32 = arith.constant 0 : i32
    %c0_i32_0 = arith.constant 0 : i32
    %c0_i32_1 = arith.constant 0 : i32
    return %c0_i32, %c0_i32_0 : i32, i32
  }
  func.func @transform_9(%arg0: i32) -> (i32, i32) {
    %c0_i32 = arith.constant 0 : i32
    %c0_i32_0 = arith.constant 0 : i32
    %c0_i32_1 = arith.constant 0 : i32
    return %c0_i32, %c0_i32_0 : i32, i32
  }
  func.func @transform_10(%arg0: i32) -> (i32, i32) {
    %c0_i32 = arith.constant 0 : i32
    %c0_i32_0 = arith.constant 0 : i32
    %c0_i32_1 = arith.constant 0 : i32
    return %c0_i32, %c0_i32_0 : i32, i32
  }
  func.func @transform_11(%arg0: i32) -> (i32, i32) {
    %c0_i32 = arith.constant 0 : i32
    %c0_i32_0 = arith.constant 0 : i32
    return %arg0, %c0_i32 : i32, i32
  }
}

</mosaic_0001>

<bundles_post_ra>
// kernel: tpu_custom_call.1
= control target key start
LH: loop header
LB: loop body
LE: loop exit
PB: predicated region body
PF: predicated region fallthrough
CT: control target
= control target key end

     0   :  { %s5835_s0 = inlined_call_operand.hbm [shape: bf16[16,384], index: 0, kind: input, shape index: {}]   ;;  %s5836_s1 = inlined_call_operand.hbm [shape: bf16[384,1024], index: 1, kind: input, shape index: {}]   ;;  %s5837_s2 = inlined_call_operand.vmem [shape: f32[1,1024], index: 2, kind: input, shape index: {}]   ;;  %s5838_s3 = inlined_call_operand.hbm [shape: bf16[1024,512], index: 3, kind: input, shape index: {}]   ;;  %s5839_s4 = inlined_call_operand.vmem [shape: f32[1,512], index: 4, kind: input, shape index: {}]   ;;  %s5840_s5 = inlined_call_operand.hbm [shape: bf16[512,256], index: 5, kind: input, shape index: {}]   ;;  %s5841_s6 = inlined_call_operand.vmem [shape: f32[1,256], index: 6, kind: input, shape index: {}]   ;;  %s5842_s7 = inlined_call_operand.hbm [shape: bf16[256,128], index: 7, kind: input, shape index: {}]   ;;  %s5843_s8 = inlined_call_operand.vmem [shape: f32[1,128], index: 8, kind: input, shape index: {}]   ;;  %s5844_s9 = inlined_call_operand.vmem [shape: f32[1,128], index: 9, kind: input, shape index: {}]   ;;  %s5845_s10 = inlined_call_operand.<no memory space> [shape: f32[1,1], index: 10, kind: input, shape index: {}]   ;;  %s5846_s11 = inlined_call_operand.vmem [shape: f32[16,1], index: 11, kind: output, shape index: {}]  }
   0x1   :  { %v16_v0 = vstv %s5845_s10 }
   0x2   :  { %17 = vst [vmem:[#allocation2] sm:$0x1] %v16_v0 }
   0x3   :  { %18 = vsyncpa [#allocation4], 0 }
   0x4   :  { %19 = vsyncpa [#allocation6], 0 }
   0x5   :  { %20 = vsyncpa [#allocation9], 0  ;;  %s5596_s19 = smov [#allocation5]   ;;  %s5480_s23 = scalar_lea.hbm %s5836_s1, 24576 }
   0x6   :  { %s38_s20 = sshll.u32 %s5596_s19, 4  ;;  %p5481_p0 = scmp.ne.s32.totalorder %s5836_s1, %s5480_s23  ;;  %s39_s20 = int_to_ptr.vmem [resolvable:$true] %s38_s20 }
   0x7   :  { %p5484_p1 = scmp.lt.u32.totalorder %s5480_s23, %s5836_s1 }
   0x9   :  { %p5486_p2 = pnand %p5484_p1, %p5481_p0 }
   0xb   :  { %5489 = shalt.err (!%p5486_p2)
}
   0xc   :  { %s5490_s10 = scalar_lea.vmem %s39_s20, 24576  ;;  %p5495_p4 = scmp.lt.s32.totalorder %s39_s20, %s39_s20 }
   0xd   :  { %p5491_p3 = scmp.ne.s32.totalorder %s39_s20, %s5490_s10  ;;  %p5496_p5 = scmp.lt.s32.totalorder %s5490_s10, %s5490_s10 }
   0xf   :  { %p5497_p6 = por %p5496_p5, %p5495_p4 }
  0x11   :  { %p5498_p7 = pnand %p5497_p6, %p5491_p3 }
  0x13   :  { %5501 = shalt.err (!%p5498_p7)
}
  0x14   :  { %s5597_s28 = smov 512   ;;  %s5598_s29 = smov 32  }
  0x15   :  { %44 = dma.hbm_to_vmem [thread:$0]  %s5836_s1, 24576, %s39_s20, [#allocation6], %s5597_s28, %s5597_s28, %s5598_s29  }
  0x16   :  { %s5599_s13 = smov [#allocation8]   ;;  %s5502_s17 = scalar_lea.hbm %s5840_s5, 8192 }
  0x17   :  { %s66_s14 = sshll.u32 %s5599_s13, 4  ;;  %p5503_p8 = scmp.ne.s32.totalorder %s5840_s5, %s5502_s17  ;;  %s67_s14 = int_to_ptr.vmem [resolvable:$true] %s66_s14 }
  0x18   :  { %p5506_p9 = scmp.lt.u32.totalorder %s5502_s17, %s5840_s5 }
  0x1a   :  { %p5508_p10 = pnand %p5506_p9, %p5503_p8 }
  0x1c   :  { %5511 = shalt.err (!%p5508_p10)
}
  0x1d   :  { %s5512_s23 = scalar_lea.vmem %s67_s14, 8192  ;;  %p5517_p12 = scmp.lt.s32.totalorder %s67_s14, %s67_s14 }
  0x1e   :  { %p5513_p11 = scmp.ne.s32.totalorder %s67_s14, %s5512_s23  ;;  %p5518_p13 = scmp.lt.s32.totalorder %s5512_s23, %s5512_s23 }
  0x20   :  { %p5519_p0 = por %p5518_p13, %p5517_p12 }
  0x22   :  { %p5520_p1 = pnand %p5519_p0, %p5513_p11 }
  0x24   :  { %5523 = shalt.err (!%p5520_p1)
}
  0x25   :  { %s5600_s1 = smov 128   ;;  %s5601_s20 = smov 8  }
  0x26   :  { %72 = dma.hbm_to_vmem [thread:$0]  %s5840_s5, 8192, %s67_s14, [#allocation9], %s5600_s1, %s5600_s1, %s5601_s20  }
  0x27   :  { %s5602_s26 = smov [#allocation3]   ;;  %s5524_s29 = scalar_lea.hbm %s5835_s0, 384 }
  0x28   :  { %s26_s27 = sshll.u32 %s5602_s26, 4  ;;  %p5525_p2 = scmp.ne.s32.totalorder %s5835_s0, %s5524_s29  ;;  %s27_s27 = int_to_ptr.vmem [resolvable:$true] %s26_s27 }
  0x29   :  { %p5528_p3 = scmp.lt.u32.totalorder %s5524_s29, %s5835_s0 }
  0x2b   :  { %p5530_p4 = pnand %p5528_p3, %p5525_p2 }
  0x2d   :  { %5533 = shalt.err (!%p5530_p4)
}
  0x2e   :  { %s5534_s16 = scalar_lea.vmem %s27_s27, 384  ;;  %p5539_p6 = scmp.lt.s32.totalorder %s27_s27, %s27_s27 }
  0x2f   :  { %p5535_p5 = scmp.ne.s32.totalorder %s27_s27, %s5534_s16  ;;  %p5540_p7 = scmp.lt.s32.totalorder %s5534_s16, %s5534_s16 }
  0x31   :  { %p5541_p8 = por %p5540_p7, %p5539_p6 }
  0x33   :  { %p5542_p9 = pnand %p5541_p8, %p5535_p5 }
  0x35   :  { %5545 = shalt.err (!%p5542_p9)
}
  0x36   :  { %s5603_s5 = smov 192   ;;  %s5604_s14 = smov 12  }
  0x37   :  { %32 = dma.hbm_to_vmem [thread:$0]  %s5835_s0, 384, %s27_s27, [#allocation4], %s5603_s5, %s5603_s5, %s5604_s14  }
  0x38   :  { %s5605_s19 = smov [#allocation7]   ;;  %s5546_s1 = scalar_lea.hbm %s5838_s3, 32768 }
  0x39   :  { %s52_s21 = sshll.u32 %s5605_s19, 4  ;;  %p5547_p10 = scmp.ne.s32.totalorder %s5838_s3, %s5546_s1  ;;  %s53_s21 = int_to_ptr.vmem [resolvable:$true] %s52_s21 }
  0x3a   :  { %p5550_p11 = scmp.lt.u32.totalorder %s5546_s1, %s5838_s3 }
  0x3c   :  { %p5552_p12 = pnand %p5550_p11, %p5547_p10 }
  0x3e   :  { %5555 = shalt.err (!%p5552_p12)
}
  0x3f   :  { %s5556_s10 = scalar_lea.vmem %s53_s21, 32768  ;;  %p5561_p0 = scmp.lt.s32.totalorder %s53_s21, %s53_s21 }
  0x40   :  { %p5557_p13 = scmp.ne.s32.totalorder %s53_s21, %s5556_s10  ;;  %p5562_p1 = scmp.lt.s32.totalorder %s5556_s10, %s5556_s10 }
  0x42   :  { %p5563_p2 = por %p5562_p1, %p5561_p0 }
  0x44   :  { %p5564_p3 = pnand %p5563_p2, %p5557_p13 }
  0x46   :  { %5567 = shalt.err (!%p5564_p3)
}
  0x47   :  { %s5606_s0 = smov 256   ;;  %s5607_s27 = smov 16  }
  0x48   :  { %58 = dma.hbm_to_vmem [thread:$0]  %s5838_s3, 32768, %s53_s21, [#allocation6], %s5606_s0, %s5606_s0, %s5607_s27  }
  0x49   :  { %s5608_s30 = smov [#allocation10]   ;;  %s5568_s16 = scalar_lea.hbm %s5842_s7, 2048 }
  0x4a   :  { %s80_s12 = sshll.u32 %s5608_s30, 4  ;;  %p5569_p4 = scmp.ne.s32.totalorder %s5842_s7, %s5568_s16  ;;  %s81_s12 = int_to_ptr.vmem [resolvable:$true] %s80_s12 }
  0x4b   :  { %p5572_p5 = scmp.lt.u32.totalorder %s5568_s16, %s5842_s7 }
  0x4d   :  { %p5574_p6 = pnand %p5572_p5, %p5569_p4 }
  0x4f   :  { %5577 = shalt.err (!%p5574_p6)
}
  0x50   :  { %s5578_s19 = scalar_lea.vmem %s81_s12, 2048  ;;  %p5583_p8 = scmp.lt.s32.totalorder %s81_s12, %s81_s12 }
  0x51   :  { %p5579_p7 = scmp.ne.s32.totalorder %s81_s12, %s5578_s19  ;;  %p5584_p9 = scmp.lt.s32.totalorder %s5578_s19, %s5578_s19 }
  0x53   :  { %p5585_p10 = por %p5584_p9, %p5583_p8 }
  0x55   :  { %p5586_p11 = pnand %p5585_p10, %p5579_p7 }
  0x57   :  { %5589 = shalt.err (!%p5586_p11)
}
  0x58   :  { %s5609_s3 = smov 64   ;;  %s5610_s21 = smov 4  }
  0x59   :  { %86 = dma.hbm_to_vmem [thread:$0]  %s5842_s7, 2048, %s81_s12, [#allocation9], %s5609_s3, %s5609_s3, %s5610_s21  }
  0x5a   :  { %5590 = dma.done.wait [#allocation4], 384  }
  0x5b   :  { %5591 = vsyncadd [#allocation4], 4294966912 }
  0x5c   :  { %5592 = dma.done.wait [#allocation6], 57344  }
  0x5d   :  { %5593 = vsyncadd [#allocation6], 4294909952 }
  0x5e   :  { %5594 = dma.done.wait [#allocation9], 10240  }
  0x5f   :  { %5595 = vsyncadd [#allocation9], 4294957056  ;;  %v5611_v1 = vmov 0   ;;  %v113_v2 = vld [vmem:[#allocation5] sm:$0xff]  ;;  %v5736_v41 = vld [vmem:[#allocation3 + $0x4] ss:$12 sps:$4 sm:$0xff]  }
  0x60   :  { %1398 = vmatprep.mubr.bf16.mxu0 %v5611_v1  ;;  %v117_v3 = vld [vmem:[#allocation5 + $0x20] sm:$0xff]  ;;  %1355 = vmatprep.mubr.bf16.mxu1 %v5736_v41  ;;  %vm4323_vm0 = vcmask 7168  }
  0x61   :  { %v121_v4 = vld [vmem:[#allocation5 + $0x40] sm:$0xff]  ;;  %v4337_v5 = vcombine.high %v113_v2, %v117_v3  ;;  %v4336_v6 = vcombine.low %v113_v2, %v117_v3 }
  0x62   :  { %v125_v7 = vld [vmem:[#allocation5 + $0x60] sm:$0xff] }
  0x63   :  { %v4345_v8 = vcombine.high %v121_v4, %v125_v7  ;;  %v129_v9 = vld [vmem:[#allocation5 + $0x80] sm:$0xff]  ;;  %1323 = vmatprep.subr.bf16.mxu1 %v4337_v5  ;;  %v4344_v11 = vcombine.low %v121_v4, %v125_v7 }
  0x64   :  { %v133_v10 = vld [vmem:[#allocation5 + $0xa0] sm:$0xff]  ;;  %1324 = vmatpush1.bf16.msra.mxu1 %v4336_v6 }
  0x65   :  { %1325 = vmatprep.subr.bf16.mxu1 %v4345_v8  ;;  %v4353_v12 = vcombine.high %v129_v9, %v133_v10  ;;  %v137_v13 = vld [vmem:[#allocation5 + $0xc0] sm:$0xff]  ;;  %v4352_v21 = vcombine.low %v129_v9, %v133_v10  ;;  %v115_v9 = vld [vmem:[#allocation5 + $0x10] sm:$0xff] }
  0x66   :  { %v141_v14 = vld [vmem:[#allocation5 + $0xe0] sm:$0xff]  ;;  %v119_v10 = vld [vmem:[#allocation5 + $0x30] sm:$0xff] }
  0x67   :  { %v241_v15 = vld [vmem:[#allocation5 + $0x400] sm:$0xff]  ;;  %v4361_v24 = vcombine.high %v137_v13, %v141_v14  ;;  %v4360_v30 = vcombine.low %v137_v13, %v141_v14 }
  0x68   :  { %v245_v16 = vld [vmem:[#allocation5 + $0x420] sm:$0xff]  ;;  %1326 = vmatpush1.bf16.msra.mxu1 %v4344_v11 }
  0x69   :  { %v4465_v17 = vcombine.high %v241_v15, %v245_v16  ;;  %v4464_v18 = vcombine.low %v241_v15, %v245_v16  ;;  %v249_v19 = vld [vmem:[#allocation5 + $0x440] sm:$0xff]  ;;  %1327 = vmatprep.subr.bf16.mxu1 %v4353_v12  ;;  %v4341_v15 = vcombine.high %v115_v9, %v119_v10 }
  0x6a   :  { %v253_v20 = vld [vmem:[#allocation5 + $0x460] sm:$0xff] }
  0x6b   :  { %v4473_v22 = vcombine.high %v249_v19, %v253_v20  ;;  %v257_v23 = vld [vmem:[#allocation5 + $0x480] sm:$0xff]  ;;  %1366 = vmatprep.subr.bf16.mxu0 %v4465_v17  ;;  %v4472_v28 = vcombine.low %v249_v19, %v253_v20  ;;  %v123_v17 = vld [vmem:[#allocation5 + $0x50] sm:$0xff] }
  0x6c   :  { %v261_v25 = vld [vmem:[#allocation5 + $0x4a0] sm:$0xff]  ;;  %1367 = vmatpush1.bf16.msra.mxu0 %v4464_v18  ;;  %1328 = vmatpush1.bf16.msra.mxu1 %v4352_v21  ;;  %v127_v18 = vld [vmem:[#allocation5 + $0x70] sm:$0xff] }
  0x6d   :  { %v145_v26 = vld [vmem:[#allocation5 + $0x100] sm:$0xff]  ;;  %1368 = vmatprep.subr.bf16.mxu0 %v4473_v22  ;;  %v4481_v29 = vcombine.high %v257_v23, %v261_v25  ;;  %1329 = vmatprep.subr.bf16.mxu1 %v4361_v24  ;;  %v4480_v36 = vcombine.low %v257_v23, %v261_v25  ;;  %v5739_v20 = vld [vmem:[#allocation3 + $0x8] ss:$12 sps:$4 sm:$0xff]   ;;  %v4340_v23 = vcombine.low %v115_v9, %v119_v10 }
  0x6e   :  { %v149_v27 = vld [vmem:[#allocation5 + $0x120] sm:$0xff]  ;;  %v4349_v24 = vcombine.high %v123_v17, %v127_v18 }
  0x6f   :  { %v265_v31 = vld [vmem:[#allocation5 + $0x4c0] sm:$0xff]  ;;  %v4369_v33 = vcombine.high %v145_v26, %v149_v27  ;;  %v4368_v40 = vcombine.low %v145_v26, %v149_v27  ;;  %v131_v26 = vld [vmem:[#allocation5 + $0x90] sm:$0xff] }
  0x70   :  { %v269_v32 = vld [vmem:[#allocation5 + $0x4e0] sm:$0xff]  ;;  %1369 = vmatpush1.bf16.msra.mxu0 %v4472_v28  ;;  %1330 = vmatpush1.bf16.msra.mxu1 %v4360_v30  ;;  %v135_v27 = vld [vmem:[#allocation5 + $0xb0] sm:$0xff] }
  0x71   :  { %v153_v34 = vld [vmem:[#allocation5 + $0x140] sm:$0xff]  ;;  %1370 = vmatprep.subr.bf16.mxu0 %v4481_v29  ;;  %v4489_v37 = vcombine.high %v265_v31, %v269_v32  ;;  %1331 = vmatprep.subr.bf16.mxu1 %v4369_v33  ;;  %v4488_v45 = vcombine.low %v265_v31, %v269_v32  ;;  %v4348_v31 = vcombine.low %v123_v17, %v127_v18 }
  0x72   :  { %v157_v35 = vld [vmem:[#allocation5 + $0x160] sm:$0xff]  ;;  %v4357_v32 = vcombine.high %v131_v26, %v135_v27 }
  0x73   :  { %v273_v38 = vld [vmem:[#allocation5 + $0x500] sm:$0xff]  ;;  %v4377_v42 = vcombine.high %v153_v34, %v157_v35  ;;  %v4376_v47 = vcombine.low %v153_v34, %v157_v35  ;;  %v139_v34 = vld [vmem:[#allocation5 + $0xd0] sm:$0xff] }
  0x74   :  { %v277_v39 = vld [vmem:[#allocation5 + $0x520] sm:$0xff]  ;;  %1371 = vmatpush1.bf16.msra.mxu0 %v4480_v36  ;;  %1332 = vmatpush1.bf16.msra.mxu1 %v4368_v40  ;;  %v143_v35 = vld [vmem:[#allocation5 + $0xf0] sm:$0xff] }
  0x75   :  { %v161_v43 = vld [vmem:[#allocation5 + $0x180] sm:$0xff]  ;;  %1372 = vmatprep.subr.bf16.mxu0 %v4489_v37  ;;  %v4497_v46 = vcombine.high %v273_v38, %v277_v39  ;;  %1333 = vmatprep.subr.bf16.mxu1 %v4377_v42  ;;  %v4496_v53 = vcombine.low %v273_v38, %v277_v39  ;;  %v4356_v39 = vcombine.low %v131_v26, %v135_v27 }
  0x76   :  { %v165_v44 = vld [vmem:[#allocation5 + $0x1a0] sm:$0xff]  ;;  %v4365_v40 = vcombine.high %v139_v34, %v143_v35 }
  0x77   :  { %v281_v48 = vld [vmem:[#allocation5 + $0x540] sm:$0xff]  ;;  %v4385_v50 = vcombine.high %v161_v43, %v165_v44  ;;  %v4384_v55 = vcombine.low %v161_v43, %v165_v44  ;;  %v147_v43 = vld [vmem:[#allocation5 + $0x110] sm:$0xff] }
  0x78   :  { %v285_v49 = vld [vmem:[#allocation5 + $0x560] sm:$0xff]  ;;  %1373 = vmatpush1.bf16.msra.mxu0 %v4488_v45  ;;  %1334 = vmatpush1.bf16.msra.mxu1 %v4376_v47  ;;  %v151_v44 = vld [vmem:[#allocation5 + $0x130] sm:$0xff] }
  0x79   :  { %v169_v51 = vld [vmem:[#allocation5 + $0x1c0] sm:$0xff]  ;;  %1374 = vmatprep.subr.bf16.mxu0 %v4497_v46  ;;  %v4505_v54 = vcombine.high %v281_v48, %v285_v49  ;;  %1335 = vmatprep.subr.bf16.mxu1 %v4385_v50  ;;  %v4504_v61 = vcombine.low %v281_v48, %v285_v49  ;;  %v4364_v48 = vcombine.low %v139_v34, %v143_v35 }
  0x7a   :  { %v173_v52 = vld [vmem:[#allocation5 + $0x1e0] sm:$0xff]  ;;  %v4373_v49 = vcombine.high %v147_v43, %v151_v44 }
  0x7b   :  { %v289_v56 = vld [vmem:[#allocation5 + $0x580] sm:$0xff]  ;;  %v4393_v58 = vcombine.high %v169_v51, %v173_v52  ;;  %v4392_v63 = vcombine.low %v169_v51, %v173_v52  ;;  %v155_v51 = vld [vmem:[#allocation5 + $0x150] sm:$0xff] }
  0x7c   :  { %v293_v57 = vld [vmem:[#allocation5 + $0x5a0] sm:$0xff]  ;;  %1375 = vmatpush1.bf16.msra.mxu0 %v4496_v53  ;;  %1336 = vmatpush1.bf16.msra.mxu1 %v4384_v55  ;;  %v159_v52 = vld [vmem:[#allocation5 + $0x170] sm:$0xff] }
  0x7d   :  { %v177_v59 = vld [vmem:[#allocation5 + $0x200] sm:$0xff]  ;;  %1376 = vmatprep.subr.bf16.mxu0 %v4505_v54  ;;  %v4513_v62 = vcombine.high %v289_v56, %v293_v57  ;;  %1337 = vmatprep.subr.bf16.mxu1 %v4393_v58  ;;  %v4512_v6 = vcombine.low %v289_v56, %v293_v57  ;;  %v4372_v56 = vcombine.low %v147_v43, %v151_v44 }
  0x7e   :  { %v181_v60 = vld [vmem:[#allocation5 + $0x220] sm:$0xff]  ;;  %v4381_v57 = vcombine.high %v155_v51, %v159_v52 }
  0x7f   :  { %v297_v0 = vld [vmem:[#allocation5 + $0x5c0] sm:$0xff]  ;;  %v4401_v3 = vcombine.high %v177_v59, %v181_v60  ;;  %v4400_v8 = vcombine.low %v177_v59, %v181_v60  ;;  %v114_v59 = vld [vmem:[#allocation5 + $0x8] sm:$0xff]  ;;  %v163_v60 = vld [vmem:[#allocation5 + $0x190] sm:$0xff] }
  0x80   :  { %v301_v2 = vld [vmem:[#allocation5 + $0x5e0] sm:$0xff]  ;;  %1377 = vmatpush1.bf16.msra.mxu0 %v4504_v61  ;;  %1338 = vmatpush1.bf16.msra.mxu1 %v4392_v63  ;;  %v167_v61 = vld [vmem:[#allocation5 + $0x1b0] sm:$0xff]  ;;  %v118_v63 = vld [vmem:[#allocation5 + $0x28] sm:$0xff] }
  0x81   :  { %v185_v4 = vld [vmem:[#allocation5 + $0x240] sm:$0xff]  ;;  %1378 = vmatprep.subr.bf16.mxu0 %v4513_v62  ;;  %v4521_v7 = vcombine.high %v297_v0, %v301_v2  ;;  %1339 = vmatprep.subr.bf16.mxu1 %v4401_v3  ;;  %v4520_v14 = vcombine.low %v297_v0, %v301_v2  ;;  %v4380_v0 = vcombine.low %v155_v51, %v159_v52 }
  0x82   :  { %v189_v5 = vld [vmem:[#allocation5 + $0x260] sm:$0xff]  ;;  %v4389_v2 = vcombine.high %v163_v60, %v167_v61  ;;  %v4339_v9 = vcombine.high %v114_v59, %v118_v63  ;;  %v4388_v10 = vcombine.low %v163_v60, %v167_v61 }
  0x83   :  { %v4409_v11 = vcombine.high %v185_v4, %v189_v5  ;;  %v193_v12 = vld [vmem:[#allocation5 + $0x280] sm:$0xff]  ;;  %v4408_v16 = vcombine.low %v185_v4, %v189_v5  ;;  %v122_v4 = vld [vmem:[#allocation5 + $0x48] sm:$0xff] }
  0x84   :  { %v197_v13 = vld [vmem:[#allocation5 + $0x2a0] sm:$0xff]  ;;  %1379 = vmatpush1.bf16.msra.mxu0 %v4512_v6  ;;  %1340 = vmatpush1.bf16.msra.mxu1 %v4400_v8  ;;  %v126_v5 = vld [vmem:[#allocation5 + $0x68] sm:$0xff]  ;;  %v171_v6 = vld [vmem:[#allocation5 + $0x1d0] sm:$0xff] }
  0x85   :  { %1380 = vmatprep.subr.bf16.mxu0 %v4521_v7  ;;  %1341 = vmatprep.subr.bf16.mxu1 %v4409_v11  ;;  %v4417_v19 = vcombine.high %v193_v12, %v197_v13  ;;  %v201_v21 = vld [vmem:[#allocation5 + $0x2c0] sm:$0xff]  ;;  %v4416_v25 = vcombine.low %v193_v12, %v197_v13  ;;  %v175_v7 = vld [vmem:[#allocation5 + $0x1f0] sm:$0xff]  ;;  %v4338_v12 = vcombine.low %v114_v59, %v118_v63  ;;  %v130_v13 = vld [vmem:[#allocation5 + $0x88] sm:$0xff] }
  0x86   :  { %v205_v22 = vld [vmem:[#allocation5 + $0x2e0] sm:$0xff]  ;;  %v5743_v8 = vld [vmem:[#allocation3] ss:$12 sps:$4 sm:$0xff]   ;;  %v4397_v11 = vcombine.high %v171_v6, %v175_v7  ;;  %v4347_v17 = vcombine.high %v122_v4, %v126_v5  ;;  %v4396_v18 = vcombine.low %v171_v6, %v175_v7 }
  0x87   :  { %v4425_v28 = vcombine.high %v201_v21, %v205_v22  ;;  %v209_v29 = vld [vmem:[#allocation5 + $0x300] sm:$0xff]  ;;  %v4424_v33 = vcombine.low %v201_v21, %v205_v22  ;;  %v4346_v21 = vcombine.low %v122_v4, %v126_v5  ;;  %v138_v22 = vld [vmem:[#allocation5 + $0xc8] sm:$0xff] }
  0x88   :  { %1381 = vmatpush1.bf16.msra.mxu0 %v4520_v14  ;;  %1342 = vmatpush1.bf16.msra.mxu1 %v4408_v16  ;;  %v213_v30 = vld [vmem:[#allocation5 + $0x320] sm:$0xff]  ;;  %v134_v14 = vld [vmem:[#allocation5 + $0xa8] sm:$0xff]  ;;  %v183_v16 = vld [vmem:[#allocation5 + $0x230] sm:$0xff] }
  0x89   :  { %1495 = vmatprep.subr.bf16.mxu0 %v4341_v15  ;;  %1343 = vmatprep.subr.bf16.mxu1 %v4417_v19  ;;  %v4433_v36 = vcombine.high %v209_v29, %v213_v30  ;;  %v217_v37 = vld [vmem:[#allocation5 + $0x340] sm:$0xff]  ;;  %v4432_v42 = vcombine.low %v209_v29, %v213_v30  ;;  %v179_v15 = vld [vmem:[#allocation5 + $0x210] sm:$0xff]  ;;  %v4355_v26 = vcombine.high %v130_v13, %v134_v14  ;;  %v146_v30 = vld [vmem:[#allocation5 + $0x108] sm:$0xff] }
  0x8a   :  { %v221_v38 = vld [vmem:[#allocation5 + $0x360] sm:$0xff]  ;;  %v4405_v19 = vcombine.high %v179_v15, %v183_v16  ;;  %v4404_v27 = vcombine.low %v179_v15, %v183_v16  ;;  %v4354_v29 = vcombine.low %v130_v13, %v134_v14  ;;  %v182_v63 = vld [vmem:[#allocation5 + $0x228] sm:$0xff] }
  0x8b   :  { %1399 = vmatmul.mubr.bf16.vlgmr.msra.gmra.mrb[0].mxu0 %v5739_v20  ;;  %v4441_v45 = vcombine.high %v217_v37, %v221_v38  ;;  %v225_v46 = vld [vmem:[#allocation5 + $0x380] sm:$0xff]  ;;  %v4440_v50 = vcombine.low %v217_v37, %v221_v38  ;;  %v154_v37 = vld [vmem:[#allocation5 + $0x148] sm:$0xff] }
  0x8c   :  { %1496 = vmatpush1.bf16.msra.mxu0 %v4340_v23  ;;  %1527 = vmatprep.mubr.bf16.mxu0 %v5736_v41  ;;  %v229_v47 = vld [vmem:[#allocation5 + $0x3a0] sm:$0xff]  ;;  %v142_v23 = vld [vmem:[#allocation5 + $0xe8] sm:$0xff] }
  0x8d   :  { %1497 = vmatprep.subr.bf16.mxu0 %v4349_v24  ;;  %1344 = vmatpush1.bf16.msra.mxu1 %v4416_v25  ;;  %v4449_v53 = vcombine.high %v225_v46, %v229_v47  ;;  %v233_v54 = vld [vmem:[#allocation5 + $0x3c0] sm:$0xff]  ;;  %v4448_v58 = vcombine.low %v225_v46, %v229_v47  ;;  %v187_v24 = vld [vmem:[#allocation5 + $0x250] sm:$0xff]  ;;  %v4363_v34 = vcombine.high %v138_v22, %v142_v23  ;;  %v158_v38 = vld [vmem:[#allocation5 + $0x168] sm:$0xff] }
  0x8e   :  { %1345 = vmatprep.subr.bf16.mxu1 %v4425_v28  ;;  %v237_v55 = vld [vmem:[#allocation5 + $0x3e0] sm:$0xff]  ;;  %v191_v25 = vld [vmem:[#allocation5 + $0x270] sm:$0xff]  ;;  %v162_v46 = vld [vmem:[#allocation5 + $0x188] sm:$0xff] }
  0x8f   :  { %v4457_v62 = vcombine.high %v233_v54, %v237_v55  ;;  %v4456_v3 = vcombine.low %v233_v54, %v237_v55  ;;  %v4413_v28 = vcombine.high %v187_v24, %v191_v25  ;;  %v4412_v35 = vcombine.low %v187_v24, %v191_v25  ;;  %v166_v47 = vld [vmem:[#allocation5 + $0x1a8] sm:$0xff] }
  0x90   :  { %1498 = vmatpush1.bf16.msra.mxu0 %v4348_v31  ;;  %v150_v31 = vld [vmem:[#allocation5 + $0x128] sm:$0xff]  ;;  %v4386_v61 = vcombine.low %v162_v46, %v166_v47 }
  0x91   :  { %1499 = vmatprep.subr.bf16.mxu0 %v4357_v32  ;;  %1346 = vmatpush1.bf16.msra.mxu1 %v4424_v33  ;;  %v195_v32 = vld [vmem:[#allocation5 + $0x290] sm:$0xff]  ;;  %v170_v54 = vld [vmem:[#allocation5 + $0x1c8] sm:$0xff] }
  0x92   :  { %1347 = vmatprep.subr.bf16.mxu1 %v4433_v36  ;;  %v199_v33 = vld [vmem:[#allocation5 + $0x2b0] sm:$0xff]  ;;  %v4362_v36 = vcombine.low %v138_v22, %v142_v23  ;;  %v174_v55 = vld [vmem:[#allocation5 + $0x1e8] sm:$0xff] }
  0x93   :  { %v4420_v43 = vcombine.low %v195_v32, %v199_v33  ;;  %v4394_v6 = vcombine.low %v170_v54, %v174_v55  ;;  %v186_v7 = vld [vmem:[#allocation5 + $0x248] sm:$0xff] }
  0x94   :  { %1500 = vmatpush1.bf16.msra.mxu0 %v4356_v39  ;;  %v203_v39 = vld [vmem:[#allocation5 + $0x2d0] sm:$0xff]  ;;  %v194_v16 = vld [vmem:[#allocation5 + $0x288] sm:$0xff] }
  0x95   :  { %1501 = vmatprep.subr.bf16.mxu0 %v4365_v40  ;;  %1348 = vmatpush1.bf16.msra.mxu1 %v4432_v42  ;;  %v207_v40 = vld [vmem:[#allocation5 + $0x2f0] sm:$0xff]  ;;  %v4371_v42 = vcombine.high %v146_v30, %v150_v31  ;;  %v202_v25 = vld [vmem:[#allocation5 + $0x2c8] sm:$0xff] }
  0x96   :  { %1349 = vmatprep.subr.bf16.mxu1 %v4441_v45  ;;  %v4429_v44 = vcombine.high %v203_v39, %v207_v40  ;;  %v4370_v45 = vcombine.low %v146_v30, %v150_v31  ;;  %v4428_v51 = vcombine.low %v203_v39, %v207_v40  ;;  %v218_v40 = vld [vmem:[#allocation5 + $0x348] sm:$0xff] }
  0x98   :  { %1502 = vmatpush1.bf16.msra.mxu0 %v4364_v48  ;;  %v211_v48 = vld [vmem:[#allocation5 + $0x310] sm:$0xff] }
  0x99   :  { %1503 = vmatprep.subr.bf16.mxu0 %v4373_v49  ;;  %1350 = vmatpush1.bf16.msra.mxu1 %v4440_v50  ;;  %v215_v49 = vld [vmem:[#allocation5 + $0x330] sm:$0xff]  ;;  %v4379_v50 = vcombine.high %v154_v37, %v158_v38 }
  0x9a   :  { %1351 = vmatprep.subr.bf16.mxu1 %v4449_v53  ;;  %v4437_v52 = vcombine.high %v211_v48, %v215_v49  ;;  %v4378_v53 = vcombine.low %v154_v37, %v158_v38  ;;  %v4436_v59 = vcombine.low %v211_v48, %v215_v49  ;;  %v226_v49 = vld [vmem:[#allocation5 + $0x388] sm:$0xff] }
  0x9c   :  { %1504 = vmatpush1.bf16.msra.mxu0 %v4372_v56  ;;  %v219_v56 = vld [vmem:[#allocation5 + $0x350] sm:$0xff] }
  0x9d   :  { %1505 = vmatprep.subr.bf16.mxu0 %v4381_v57  ;;  %1352 = vmatpush1.bf16.msra.mxu1 %v4448_v58  ;;  %v223_v57 = vld [vmem:[#allocation5 + $0x370] sm:$0xff]  ;;  %v4387_v58 = vcombine.high %v162_v46, %v166_v47 }
  0x9e   :  { %1353 = vmatprep.subr.bf16.mxu1 %v4457_v62  ;;  %v4445_v60 = vcombine.high %v219_v56, %v223_v57  ;;  %v178_v62 = vld [vmem:[#allocation5 + $0x208] sm:$0xff]  ;;  %v4444_v4 = vcombine.low %v219_v56, %v223_v57 }
  0x9f   :  { %v4402_v15 = vcombine.low %v178_v62, %v182_v63  ;;  %v234_v57 = vld [vmem:[#allocation5 + $0x3c8] sm:$0xff] }
  0xa0   :  { %1506 = vmatpush1.bf16.msra.mxu0 %v4380_v0  ;;  %v227_v0 = vld [vmem:[#allocation5 + $0x390] sm:$0xff] }
  0xa1   :  { %1507 = vmatprep.subr.bf16.mxu0 %v4389_v2  ;;  %1354 = vmatpush1.bf16.msra.mxu1 %v4456_v3  ;;  %v231_v2 = vld [vmem:[#allocation5 + $0x3b0] sm:$0xff]  ;;  %v4395_v3 = vcombine.high %v170_v54, %v174_v55 }
  0xa2   :  { %1409 = vmatprep.subr.bf16.mxu1 %v4339_v9  ;;  %v4453_v5 = vcombine.high %v227_v0, %v231_v2  ;;  %v190_v9 = vld [vmem:[#allocation5 + $0x268] sm:$0xff]  ;;  %v4452_v13 = vcombine.low %v227_v0, %v231_v2 }
  0xa3   :  { %v4410_v24 = vcombine.low %v186_v7, %v190_v9  ;;  %v242_v2 = vld [vmem:[#allocation5 + $0x408] sm:$0xff] }
  0xa4   :  { %1508 = vmatpush1.bf16.msra.mxu0 %v4388_v10  ;;  %1356 = vmatmul.mubr.bf16.vlgmr.msra.gmra.mrb[0].mxu1 %v5743_v8  ;;  %v235_v10 = vld [vmem:[#allocation5 + $0x3d0] sm:$0xff] }
  0xa5   :  { %1509 = vmatprep.subr.bf16.mxu0 %v4397_v11  ;;  %1410 = vmatpush1.bf16.msra.mxu1 %v4338_v12  ;;  %v239_v11 = vld [vmem:[#allocation5 + $0x3f0] sm:$0xff]  ;;  %v4403_v12 = vcombine.high %v178_v62, %v182_v63 }
  0xa6   :  { %1441 = vmatprep.mubr.bf16.mxu1 %v5736_v41  ;;  %1411 = vmatprep.subr.bf16.mxu1 %v4347_v17  ;;  %v4421_v41 = vcombine.high %v195_v32, %v199_v33  ;;  %v4461_v14 = vcombine.high %v235_v10, %v239_v11  ;;  %v198_v17 = vld [vmem:[#allocation5 + $0x2a8] sm:$0xff]  ;;  %v4460_v22 = vcombine.low %v235_v10, %v239_v11 }
  0xa7   :  { %v4418_v32 = vcombine.low %v194_v16, %v198_v17  ;;  %v210_v33 = vld [vmem:[#allocation5 + $0x308] sm:$0xff] }
  0xa8   :  { %1510 = vmatpush1.bf16.msra.mxu0 %v4396_v18  ;;  %v243_v18 = vld [vmem:[#allocation5 + $0x410] sm:$0xff]  ;;  %v250_v11 = vld [vmem:[#allocation5 + $0x448] sm:$0xff] }
  0xa9   :  { %1511 = vmatprep.subr.bf16.mxu0 %v4405_v19  ;;  %1412 = vmatpush1.bf16.msra.mxu1 %v4346_v21  ;;  %v247_v19 = vld [vmem:[#allocation5 + $0x430] sm:$0xff]  ;;  %v4411_v21 = vcombine.high %v186_v7, %v190_v9 }
  0xaa   :  { %1413 = vmatprep.subr.bf16.mxu1 %v4355_v26  ;;  %v4469_v23 = vcombine.high %v243_v18, %v247_v19  ;;  %v206_v26 = vld [vmem:[#allocation5 + $0x2e8] sm:$0xff]  ;;  %v4468_v30 = vcombine.low %v243_v18, %v247_v19 }
  0xab   :  { %v4426_v39 = vcombine.low %v202_v25, %v206_v26 }
  0xac   :  { %1512 = vmatpush1.bf16.msra.mxu0 %v4404_v27  ;;  %v251_v27 = vld [vmem:[#allocation5 + $0x450] sm:$0xff] }
  0xad   :  { %1513 = vmatprep.subr.bf16.mxu0 %v4413_v28  ;;  %1414 = vmatpush1.bf16.msra.mxu1 %v4354_v29  ;;  %v255_v28 = vld [vmem:[#allocation5 + $0x470] sm:$0xff]  ;;  %v4419_v29 = vcombine.high %v194_v16, %v198_v17 }
  0xae   :  { %1415 = vmatprep.subr.bf16.mxu1 %v4363_v34  ;;  %v4477_v31 = vcombine.high %v251_v27, %v255_v28  ;;  %v214_v34 = vld [vmem:[#allocation5 + $0x328] sm:$0xff]  ;;  %v4476_v37 = vcombine.low %v251_v27, %v255_v28  ;;  %v4981_v28 = vld [vmem:[#allocation7] ss:$16 sps:$4 sm:$0xff]  }
  0xaf   :  { %v4434_v48 = vcombine.low %v210_v33, %v214_v34  ;;  %v270_v27 = vld [vmem:[#allocation5 + $0x4e8] sm:$0xff] }
  0xb0   :  { %1514 = vmatpush1.bf16.msra.mxu0 %v4412_v35  ;;  %v259_v35 = vld [vmem:[#allocation5 + $0x490] sm:$0xff] }
  0xb1   :  { %1515 = vmatprep.subr.bf16.mxu0 %v4421_v41  ;;  %1416 = vmatpush1.bf16.msra.mxu1 %v4362_v36  ;;  %v263_v41 = vld [vmem:[#allocation5 + $0x4b0] sm:$0xff]  ;;  %v4427_v36 = vcombine.high %v202_v25, %v206_v26  ;;  %v266_v26 = vld [vmem:[#allocation5 + $0x4c8] sm:$0xff] }
  0xb2   :  { %1417 = vmatprep.subr.bf16.mxu1 %v4371_v42  ;;  %v4485_v38 = vcombine.high %v259_v35, %v263_v41  ;;  %v222_v42 = vld [vmem:[#allocation5 + $0x368] sm:$0xff]  ;;  %v4484_v46 = vcombine.low %v259_v35, %v263_v41  ;;  %v4989_v35 = vld [vmem:[#allocation7 + $0x44] ss:$16 sps:$4 sm:$0xff]   ;;  %v4490_v41 = vcombine.low %v266_v26, %v270_v27 }
  0xb3   :  { %v4442_v56 = vcombine.low %v218_v40, %v222_v42 }
  0xb4   :  { %1516 = vmatpush1.bf16.msra.mxu0 %v4420_v43  ;;  %v267_v43 = vld [vmem:[#allocation5 + $0x4d0] sm:$0xff] }
  0xb5   :  { %1517 = vmatprep.subr.bf16.mxu0 %v4429_v44  ;;  %1418 = vmatpush1.bf16.msra.mxu1 %v4370_v45  ;;  %v271_v44 = vld [vmem:[#allocation5 + $0x4f0] sm:$0xff]  ;;  %v4435_v45 = vcombine.high %v210_v33, %v214_v34  ;;  %v278_v33 = vld [vmem:[#allocation5 + $0x528] sm:$0xff] }
  0xb6   :  { %1419 = vmatprep.subr.bf16.mxu1 %v4379_v50  ;;  %v4493_v47 = vcombine.high %v267_v43, %v271_v44  ;;  %v230_v50 = vld [vmem:[#allocation5 + $0x3a8] sm:$0xff]  ;;  %v4492_v54 = vcombine.low %v267_v43, %v271_v44  ;;  %v4984_v34 = vld [vmem:[#allocation7 + $0x20] ss:$16 sps:$4 sm:$0xff]  }
  0xb7   :  { %v4450_v0 = vcombine.low %v226_v49, %v230_v50  ;;  %v290_v43 = vld [vmem:[#allocation5 + $0x588] sm:$0xff] }
  0xb8   :  { %1518 = vmatpush1.bf16.msra.mxu0 %v4428_v51  ;;  %v275_v51 = vld [vmem:[#allocation5 + $0x510] sm:$0xff]  ;;  %v294_v44 = vld [vmem:[#allocation5 + $0x5a8] sm:$0xff] }
  0xb9   :  { %1519 = vmatprep.subr.bf16.mxu0 %v4437_v52  ;;  %1420 = vmatpush1.bf16.msra.mxu1 %v4378_v53  ;;  %v279_v52 = vld [vmem:[#allocation5 + $0x530] sm:$0xff]  ;;  %v4443_v53 = vcombine.high %v218_v40, %v222_v42 }
  0xba   :  { %1421 = vmatprep.subr.bf16.mxu1 %v4387_v58  ;;  %v4501_v55 = vcombine.high %v275_v51, %v279_v52  ;;  %v238_v58 = vld [vmem:[#allocation5 + $0x3e8] sm:$0xff]  ;;  %v4500_v62 = vcombine.low %v275_v51, %v279_v52  ;;  %v4992_v40 = vld [vmem:[#allocation7 + $0x64] ss:$16 sps:$4 sm:$0xff]   ;;  %v4993_v51 = vld [vmem:[#allocation7 + $0x80] ss:$16 sps:$4 sm:$0xff]  }
  0xbb   :  { %v4458_v10 = vcombine.low %v234_v57, %v238_v58  ;;  %v4998_v52 = vld [vmem:[#allocation7 + $0xa4] ss:$16 sps:$4 sm:$0xff]  }
  0xbc   :  { %1520 = vmatpush1.bf16.msra.mxu0 %v4436_v59  ;;  %v283_v59 = vld [vmem:[#allocation5 + $0x550] sm:$0xff] }
  0xbd   :  { %1521 = vmatprep.subr.bf16.mxu0 %v4445_v60  ;;  %1422 = vmatpush1.bf16.msra.mxu1 %v4386_v61  ;;  %v287_v60 = vld [vmem:[#allocation5 + $0x570] sm:$0xff]  ;;  %v4451_v61 = vcombine.high %v226_v49, %v230_v50  ;;  %v4515_v49 = vcombine.high %v290_v43, %v294_v44  ;;  %v302_v50 = vld [vmem:[#allocation5 + $0x5e8] sm:$0xff] }
  0xbe   :  { %1423 = vmatprep.subr.bf16.mxu1 %v4395_v3  ;;  %v4509_v63 = vcombine.high %v283_v59, %v287_v60  ;;  %v246_v3 = vld [vmem:[#allocation5 + $0x428] sm:$0xff]  ;;  %v4508_v7 = vcombine.low %v283_v59, %v287_v60  ;;  %v124_v60 = vld [vmem:[#allocation5 + $0x58] sm:$0xff] }
  0xbf   :  { %v4466_v18 = vcombine.low %v242_v2, %v246_v3 }
  0xc0   :  { %1522 = vmatpush1.bf16.msra.mxu0 %v4444_v4  ;;  %v291_v4 = vld [vmem:[#allocation5 + $0x590] sm:$0xff] }
  0xc1   :  { %1523 = vmatprep.subr.bf16.mxu0 %v4453_v5  ;;  %1424 = vmatpush1.bf16.msra.mxu1 %v4394_v6  ;;  %v295_v5 = vld [vmem:[#allocation5 + $0x5b0] sm:$0xff]  ;;  %v4459_v6 = vcombine.high %v234_v57, %v238_v58 }
  0xc2   :  { %1425 = vmatprep.subr.bf16.mxu1 %v4403_v12  ;;  %v4517_v9 = vcombine.high %v291_v4, %v295_v5  ;;  %v254_v12 = vld [vmem:[#allocation5 + $0x468] sm:$0xff]  ;;  %v4516_v16 = vcombine.low %v291_v4, %v295_v5  ;;  %v4996_v57 = vld [vmem:[#allocation7 + $0xa0] ss:$16 sps:$4 sm:$0xff]   ;;  %v5001_v58 = vld [vmem:[#allocation7 + $0xc4] ss:$16 sps:$4 sm:$0xff]  }
  0xc3   :  { %v4475_v19 = vcombine.high %v250_v11, %v254_v12  ;;  %v4474_v25 = vcombine.low %v250_v11, %v254_v12  ;;  %v136_v4 = vld [vmem:[#allocation5 + $0xb8] sm:$0xff] }
  0xc4   :  { %1524 = vmatpush1.bf16.msra.mxu0 %v4452_v13  ;;  %v299_v13 = vld [vmem:[#allocation5 + $0x5d0] sm:$0xff]  ;;  %v140_v11 = vld [vmem:[#allocation5 + $0xd8] sm:$0xff] }
  0xc5   :  { %1525 = vmatprep.subr.bf16.mxu0 %v4461_v14  ;;  %1426 = vmatpush1.bf16.msra.mxu1 %v4402_v15  ;;  %v303_v14 = vld [vmem:[#allocation5 + $0x5f0] sm:$0xff]  ;;  %v4467_v15 = vcombine.high %v242_v2, %v246_v3  ;;  %v132_v3 = vld [vmem:[#allocation5 + $0x98] sm:$0xff] }
  0xc6   :  { %1427 = vmatprep.subr.bf16.mxu1 %v4411_v21  ;;  %v4525_v17 = vcombine.high %v299_v13, %v303_v14  ;;  %v258_v21 = vld [vmem:[#allocation5 + $0x488] sm:$0xff]  ;;  %v144_v12 = vld [vmem:[#allocation5 + $0xf8] sm:$0xff] }
  0xc8   :  { %1526 = vmatpush1.bf16.msra.mxu0 %v4460_v22  ;;  %v262_v22 = vld [vmem:[#allocation5 + $0x4a8] sm:$0xff] }
  0xc9   :  { %1538 = vmatprep.subr.bf16.mxu0 %v4469_v23  ;;  %1428 = vmatpush1.bf16.msra.mxu1 %v4410_v24  ;;  %v4524_v23 = vcombine.low %v299_v13, %v303_v14  ;;  %v4983_v24 = vld [vmem:[#allocation7 + $0x4] ss:$16 sps:$4 sm:$0xff]   ;;  %v5478_v13 = vld [vmem:[#allocation3 + $0x4] ss:$12 sps:$4 sm:$0xff]   ;;  %v4359_v14 = vcombine.high %v132_v3, %v136_v4 }
  0xca   :  { %1429 = vmatprep.subr.bf16.mxu1 %v4419_v29  ;;  %v4483_v29 = vcombine.high %v258_v21, %v262_v22 }
  0xcb   :  { %1528 = vmatmul.mubr.bf16.vlgmr.msra.gmra.mrb[4].mxu0 %v5743_v8 }
  0xcc   :  { %1539 = vmatpush1.bf16.msra.mxu0 %v4468_v30  ;;  %1570 = vmatprep.mubr.bf16.mxu0 %v5611_v1  ;;  %v4986_v30 = vld [vmem:[#allocation7 + $0x24] ss:$16 sps:$4 sm:$0xff]  }
  0xcd   :  { %1540 = vmatprep.subr.bf16.mxu0 %v4477_v31  ;;  %1430 = vmatpush1.bf16.msra.mxu1 %v4418_v32  ;;  %v4482_v31 = vcombine.low %v258_v21, %v262_v22  ;;  %v274_v32 = vld [vmem:[#allocation5 + $0x508] sm:$0xff]  ;;  %v5014_v21 = vld [vmem:[#allocation7 + $0x120] ss:$16 sps:$4 sm:$0xff]   ;;  %v4367_v22 = vcombine.high %v140_v11, %v144_v12 }
  0xce   :  { %1431 = vmatprep.subr.bf16.mxu1 %v4427_v36  ;;  %v282_v36 = vld [vmem:[#allocation5 + $0x548] sm:$0xff]  ;;  %v4498_v42 = vcombine.low %v274_v32, %v278_v33 }
  0xd0   :  { %1541 = vmatpush1.bf16.msra.mxu0 %v4476_v37  ;;  %v286_v37 = vld [vmem:[#allocation5 + $0x568] sm:$0xff] }
  0xd1   :  { %1542 = vmatprep.subr.bf16.mxu0 %v4485_v38  ;;  %1432 = vmatpush1.bf16.msra.mxu1 %v4426_v39  ;;  %v4987_v38 = vld [vmem:[#allocation7 + $0x40] ss:$16 sps:$4 sm:$0xff]   ;;  %v4499_v39 = vcombine.high %v274_v32, %v278_v33  ;;  %v168_v32 = vld [vmem:[#allocation5 + $0x1b8] sm:$0xff] }
  0xd2   :  { %1433 = vmatprep.subr.bf16.mxu1 %v4435_v45  ;;  %v4990_v45 = vld [vmem:[#allocation7 + $0x60] ss:$16 sps:$4 sm:$0xff]  }
  0xd3   :  { %v5026_v33 = vld [vmem:[#allocation7 + $0x160] ss:$16 sps:$4 sm:$0xff]  }
  0xd4   :  { %1543 = vmatpush1.bf16.msra.mxu0 %v4484_v46  ;;  %v4995_v46 = vld [vmem:[#allocation7 + $0x84] ss:$16 sps:$4 sm:$0xff]  }
  0xd5   :  { %1544 = vmatprep.subr.bf16.mxu0 %v4493_v47  ;;  %1434 = vmatpush1.bf16.msra.mxu1 %v4434_v48  ;;  %v4506_v47 = vcombine.low %v282_v36, %v286_v37  ;;  %v298_v48 = vld [vmem:[#allocation5 + $0x5c8] sm:$0xff] }
  0xd6   :  { %1435 = vmatprep.subr.bf16.mxu1 %v4443_v53  ;;  %v4514_v53 = vcombine.low %v290_v43, %v294_v44  ;;  %v4522_v59 = vcombine.low %v298_v48, %v302_v50  ;;  %v184_v43 = vld [vmem:[#allocation5 + $0x238] sm:$0xff]  ;;  %v5038_v44 = vld [vmem:[#allocation7 + $0x1a0] ss:$16 sps:$4 sm:$0xff]  }
  0xd8   :  { %1545 = vmatpush1.bf16.msra.mxu0 %v4492_v54  ;;  %v116_v54 = vld [vmem:[#allocation5 + $0x18] sm:$0xff] }
  0xd9   :  { %1546 = vmatprep.subr.bf16.mxu0 %v4501_v55  ;;  %1436 = vmatpush1.bf16.msra.mxu1 %v4442_v56  ;;  %v4523_v55 = vcombine.high %v298_v48, %v302_v50  ;;  %v120_v56 = vld [vmem:[#allocation5 + $0x38] sm:$0xff] }
  0xda   :  { %1437 = vmatprep.subr.bf16.mxu1 %v4451_v61  ;;  %v4343_v61 = vcombine.high %v116_v54, %v120_v56  ;;  %v4342_v2 = vcombine.low %v116_v54, %v120_v56  ;;  %v192_v48 = vld [vmem:[#allocation5 + $0x278] sm:$0xff]  ;;  %v5050_v56 = vld [vmem:[#allocation7 + $0x1e0] ss:$16 sps:$4 sm:$0xff]  }
  0xdb   :  { %v200_v54 = vld [vmem:[#allocation5 + $0x2b8] sm:$0xff] }
  0xdc   :  { %1547 = vmatpush1.bf16.msra.mxu0 %v4500_v62  ;;  %v128_v62 = vld [vmem:[#allocation5 + $0x78] sm:$0xff] }
  0xdd   :  { %1548 = vmatprep.subr.bf16.mxu0 %v4509_v63  ;;  %1438 = vmatpush1.bf16.msra.mxu1 %v4450_v0  ;;  %v4999_v63 = vld [vmem:[#allocation7 + $0xc0] ss:$16 sps:$4 sm:$0xff]   ;;  %v5004_v0 = vld [vmem:[#allocation7 + $0xe4] ss:$16 sps:$4 sm:$0xff]   ;;  %v4351_v5 = vcombine.high %v124_v60, %v128_v62 }
  0xde   :  { %1439 = vmatprep.subr.bf16.mxu1 %v4459_v6  ;;  %v5002_v6 = vld [vmem:[#allocation7 + $0xe0] ss:$16 sps:$4 sm:$0xff]  }
  0xe0   :  { %1549 = vmatpush1.bf16.msra.mxu0 %v4508_v7  ;;  %v5010_v7 = vld [vmem:[#allocation7 + $0x104] ss:$16 sps:$4 sm:$0xff]  }
  0xe1   :  { %1550 = vmatprep.subr.bf16.mxu0 %v4517_v9  ;;  %1440 = vmatpush1.bf16.msra.mxu1 %v4458_v10  ;;  %v5752_v9 = vld [vmem:[#allocation3 + $0x8] ss:$12 sps:$4 sm:$0xff]   ;;  %v4350_v10 = vcombine.low %v124_v60, %v128_v62 }
  0xe2   :  { %1452 = vmatprep.subr.bf16.mxu1 %v4467_v15  ;;  %v5008_v15 = vld [vmem:[#allocation7 + $0x100] ss:$16 sps:$4 sm:$0xff]  }
  0xe4   :  { %1551 = vmatpush1.bf16.msra.mxu0 %v4516_v16  ;;  %1442 = vmatmul.mubr.bf16.vlgmr.msra.gmra.mrb[4].mxu1 %v5743_v8  ;;  %v4491_v8 = vcombine.high %v266_v26, %v270_v27  ;;  %v5016_v16 = vld [vmem:[#allocation7 + $0x124] ss:$16 sps:$4 sm:$0xff]   ;;  %v160_v26 = vld [vmem:[#allocation5 + $0x178] sm:$0xff]  ;;  %v5020_v27 = vld [vmem:[#allocation7 + $0x140] ss:$16 sps:$4 sm:$0xff]  }
  0xe5   :  { %1552 = vmatprep.subr.bf16.mxu0 %v4525_v17  ;;  %1453 = vmatpush1.bf16.msra.mxu1 %v4466_v18  ;;  %v4358_v17 = vcombine.low %v132_v3, %v136_v4  ;;  %v148_v18 = vld [vmem:[#allocation5 + $0x118] sm:$0xff] }
  0xe6   :  { %1484 = vmatprep.mubr.bf16.mxu1 %v5611_v1  ;;  %1454 = vmatprep.subr.bf16.mxu1 %v4475_v19  ;;  %v152_v19 = vld [vmem:[#allocation5 + $0x138] sm:$0xff] }
  0xe7   :  { %v220_v4 = vld [vmem:[#allocation5 + $0x358] sm:$0xff] }
  0xe8   :  { %1553 = vmatpush1.bf16.msra.mxu0 %v4524_v23  ;;  %v5022_v23 = vld [vmem:[#allocation7 + $0x144] ss:$16 sps:$4 sm:$0xff]  }
  0xe9   :  { %3265 = vmatprep.subr.bf16.mxu0 %v4983_v24  ;;  %1455 = vmatpush1.bf16.msra.mxu1 %v4474_v25  ;;  %v4366_v24 = vcombine.low %v140_v11, %v144_v12  ;;  %v156_v25 = vld [vmem:[#allocation5 + $0x158] sm:$0xff] }
  0xea   :  { %1456 = vmatprep.subr.bf16.mxu1 %v4483_v29  ;;  %v5028_v29 = vld [vmem:[#allocation7 + $0x164] ss:$16 sps:$4 sm:$0xff]   ;;  %v232_v12 = vld [vmem:[#allocation5 + $0x3b8] sm:$0xff] }
  0xeb   :  { %1571 = vmatmul.mubr.bf16.vlgmr.msra.gmra.mrb[4].mxu0 %v5739_v20  ;;  %v4507_v20 = vcombine.high %v282_v36, %v286_v37  ;;  %v176_v36 = vld [vmem:[#allocation5 + $0x1f8] sm:$0xff]  ;;  %v5032_v37 = vld [vmem:[#allocation7 + $0x180] ss:$16 sps:$4 sm:$0xff]  }
  0xec   :  { %3266 = vmatpush1.bf16.msra.mxu0 %v4981_v28  ;;  %v4375_v28 = vcombine.high %v148_v18, %v152_v19 }
  0xed   :  { %3267 = vmatprep.subr.bf16.mxu0 %v4986_v30  ;;  %1457 = vmatpush1.bf16.msra.mxu1 %v4482_v31  ;;  %v4374_v30 = vcombine.low %v148_v18, %v152_v19  ;;  %v164_v31 = vld [vmem:[#allocation5 + $0x198] sm:$0xff] }
  0xee   :  { %1458 = vmatprep.subr.bf16.mxu1 %v4491_v8  ;;  %v5034_v8 = vld [vmem:[#allocation7 + $0x184] ss:$16 sps:$4 sm:$0xff]   ;;  %v244_v19 = vld [vmem:[#allocation5 + $0x418] sm:$0xff] }
  0xf0   :  { %3268 = vmatpush1.bf16.msra.mxu0 %v4984_v34  ;;  %v4383_v34 = vcombine.high %v156_v25, %v160_v26 }
  0xf1   :  { %3269 = vmatprep.subr.bf16.mxu0 %v4989_v35  ;;  %1459 = vmatpush1.bf16.msra.mxu1 %v4490_v41  ;;  %v4382_v35 = vcombine.low %v156_v25, %v160_v26  ;;  %v172_v41 = vld [vmem:[#allocation5 + $0x1d8] sm:$0xff] }
  0xf2   :  { %1460 = vmatprep.subr.bf16.mxu1 %v4499_v39  ;;  %v5040_v39 = vld [vmem:[#allocation7 + $0x1a4] ss:$16 sps:$4 sm:$0xff]   ;;  %v256_v25 = vld [vmem:[#allocation5 + $0x478] sm:$0xff] }
  0xf4   :  { %3270 = vmatpush1.bf16.msra.mxu0 %v4987_v38  ;;  %v4391_v38 = vcombine.high %v164_v31, %v168_v32 }
  0xf5   :  { %3271 = vmatprep.subr.bf16.mxu0 %v4992_v40  ;;  %1461 = vmatpush1.bf16.msra.mxu1 %v4498_v42  ;;  %v4390_v40 = vcombine.low %v164_v31, %v168_v32  ;;  %v180_v42 = vld [vmem:[#allocation5 + $0x218] sm:$0xff] }
  0xf6   :  { %1462 = vmatprep.subr.bf16.mxu1 %v4507_v20  ;;  %v5046_v20 = vld [vmem:[#allocation7 + $0x1c4] ss:$16 sps:$4 sm:$0xff]   ;;  %v4407_v50 = vcombine.high %v180_v42, %v184_v43 }
  0xf8   :  { %3272 = vmatpush1.bf16.msra.mxu0 %v4990_v45  ;;  %v4399_v45 = vcombine.high %v172_v41, %v176_v36 }
  0xf9   :  { %3273 = vmatprep.subr.bf16.mxu0 %v4995_v46  ;;  %1463 = vmatpush1.bf16.msra.mxu1 %v4506_v47  ;;  %v4398_v46 = vcombine.low %v172_v41, %v176_v36  ;;  %v188_v47 = vld [vmem:[#allocation5 + $0x258] sm:$0xff] }
  0xfa   :  { %1464 = vmatprep.subr.bf16.mxu1 %v4515_v49  ;;  %v5044_v49 = vld [vmem:[#allocation7 + $0x1c0] ss:$16 sps:$4 sm:$0xff]   ;;  %v276_v41 = vld [vmem:[#allocation5 + $0x518] sm:$0xff] }
  0xfb   :  { %v280_v36 = vld [vmem:[#allocation5 + $0x538] sm:$0xff] }
  0xfc   :  { %3274 = vmatpush1.bf16.msra.mxu0 %v4993_v51  ;;  %v5052_v51 = vld [vmem:[#allocation7 + $0x1e4] ss:$16 sps:$4 sm:$0xff]  }
  0xfd   :  { %3275 = vmatprep.subr.bf16.mxu0 %v4998_v52  ;;  %1465 = vmatpush1.bf16.msra.mxu1 %v4514_v53  ;;  %v4406_v52 = vcombine.low %v180_v42, %v184_v43  ;;  %v196_v53 = vld [vmem:[#allocation5 + $0x298] sm:$0xff]  ;;  %v4502_v42 = vcombine.low %v276_v41, %v280_v36 }
  0xfe   :  { %1466 = vmatprep.subr.bf16.mxu1 %v4523_v55  ;;  %v4415_v55 = vcombine.high %v188_v47, %v192_v48  ;;  %v4423_v60 = vcombine.high %v196_v53, %v200_v54  ;;  %v4422_v62 = vcombine.low %v196_v53, %v200_v54  ;;  %v292_v43 = vld [vmem:[#allocation5 + $0x598] sm:$0xff] }
 0x100   :  { %3276 = vmatpush1.bf16.msra.mxu0 %v4996_v57  ;;  %v5079_v57 = vld [vmem:[#allocation7 + $0x204] ss:$16 sps:$4 sm:$0xff]  }
 0x101   :  { %3277 = vmatprep.subr.bf16.mxu0 %v5001_v58  ;;  %1467 = vmatpush1.bf16.msra.mxu1 %v4522_v59  ;;  %v4414_v58 = vcombine.low %v188_v47, %v192_v48  ;;  %v204_v59 = vld [vmem:[#allocation5 + $0x2d8] sm:$0xff] }
 0x102   :  { %1581 = vmatprep.subr.bf16.mxu1 %v4343_v61  ;;  %v208_v61 = vld [vmem:[#allocation5 + $0x2f8] sm:$0xff] }
 0x103   :  { %v4430_v3 = vcombine.low %v204_v59, %v208_v61  ;;  %v304_v47 = vld [vmem:[#allocation5 + $0x5f8] sm:$0xff] }
 0x104   :  { %3278 = vmatpush1.bf16.msra.mxu0 %v4999_v63  ;;  %1485 = vmatmul.mubr.bf16.vlgmr.msra.gmra.mrb[4].mxu1 %v5752_v9  ;;  %v212_v63 = vld [vmem:[#allocation5 + $0x318] sm:$0xff] }
 0x105   :  { %3279 = vmatprep.subr.bf16.mxu0 %v5004_v0  ;;  %1582 = vmatpush1.bf16.msra.mxu1 %v4342_v2  ;;  %v4431_v0 = vcombine.high %v204_v59, %v208_v61  ;;  %v216_v2 = vld [vmem:[#allocation5 + $0x338] sm:$0xff] }
 0x106   :  { %1613 = vmatprep.mubr.bf16.mxu1 %v5478_v13  ;;  %1583 = vmatprep.subr.bf16.mxu1 %v4351_v5  ;;  %v4439_v5 = vcombine.high %v212_v63, %v216_v2  ;;  %v5019_v59 = vld [vmem:[#allocation7 + $0x4c] ss:$16 sps:$4 sm:$0xff]   ;;  %v5017_v61 = vld [vmem:[#allocation7 + $0x48] ss:$16 sps:$4 sm:$0xff]  }
 0x108   :  { %3280 = vmatpush1.bf16.msra.mxu0 %v5002_v6  ;;  %v224_v6 = vld [vmem:[#allocation5 + $0x378] sm:$0xff] }
 0x109   :  { %3281 = vmatprep.subr.bf16.mxu0 %v5010_v7  ;;  %1584 = vmatpush1.bf16.msra.mxu1 %v4350_v10  ;;  %v4438_v7 = vcombine.low %v212_v63, %v216_v2  ;;  %v228_v10 = vld [vmem:[#allocation5 + $0x398] sm:$0xff]  ;;  %v4447_v11 = vcombine.high %v220_v4, %v224_v6  ;;  %v4446_v13 = vcombine.low %v220_v4, %v224_v6  ;;  %v5765_v4 = vld [vmem:[%s5837_s2] sm:$0xff] }
 0x10a   :  { %1585 = vmatprep.subr.bf16.mxu1 %v4359_v14  ;;  %v4455_v14 = vcombine.high %v228_v10, %v232_v12  ;;  %v5031_v2 = vld [vmem:[#allocation7 + $0x8c] ss:$16 sps:$4 sm:$0xff]  }
 0x10b   :  { %v5037_v6 = vld [vmem:[#allocation7 + $0xac] ss:$16 sps:$4 sm:$0xff]  }
 0x10c   :  { %3282 = vmatpush1.bf16.msra.mxu0 %v5008_v15  ;;  %v236_v15 = vld [vmem:[#allocation5 + $0x3d8] sm:$0xff] }
 0x10d   :  { %3283 = vmatprep.subr.bf16.mxu0 %v5016_v16  ;;  %1586 = vmatpush1.bf16.msra.mxu1 %v4358_v17  ;;  %v240_v16 = vld [vmem:[#allocation5 + $0x3f8] sm:$0xff]  ;;  %v4454_v17 = vcombine.low %v228_v10, %v232_v12 }
 0x10e   :  { %1587 = vmatprep.subr.bf16.mxu1 %v4367_v22  ;;  %v4463_v18 = vcombine.high %v236_v15, %v240_v16  ;;  %v4462_v22 = vcombine.low %v236_v15, %v240_v16  ;;  %v5043_v12 = vld [vmem:[#allocation7 + $0xcc] ss:$16 sps:$4 sm:$0xff]  }
 0x110   :  { %3284 = vmatpush1.bf16.msra.mxu0 %v5014_v21  ;;  %v248_v21 = vld [vmem:[#allocation5 + $0x438] sm:$0xff] }
 0x111   :  { %3285 = vmatprep.subr.bf16.mxu0 %v5022_v23  ;;  %1588 = vmatpush1.bf16.msra.mxu1 %v4366_v24  ;;  %v4471_v23 = vcombine.high %v244_v19, %v248_v21  ;;  %v252_v24 = vld [vmem:[#allocation5 + $0x458] sm:$0xff]  ;;  %v4470_v26 = vcombine.low %v244_v19, %v248_v21 }
 0x112   :  { %1589 = vmatprep.subr.bf16.mxu1 %v4375_v28  ;;  %v260_v28 = vld [vmem:[#allocation5 + $0x498] sm:$0xff]  ;;  %v4478_v31 = vcombine.low %v252_v24, %v256_v25 }
 0x114   :  { %3286 = vmatpush1.bf16.msra.mxu0 %v5020_v27  ;;  %v4479_v27 = vcombine.high %v252_v24, %v256_v25 }
 0x115   :  { %3287 = vmatprep.subr.bf16.mxu0 %v5028_v29  ;;  %1590 = vmatpush1.bf16.msra.mxu1 %v4374_v30  ;;  %v264_v29 = vld [vmem:[#allocation5 + $0x4b8] sm:$0xff]  ;;  %v5479_v30 = vld [vmem:[#allocation3] ss:$12 sps:$4 sm:$0xff]  }
 0x116   :  { %1591 = vmatprep.subr.bf16.mxu1 %v4383_v34  ;;  %v4487_v32 = vcombine.high %v260_v28, %v264_v29  ;;  %v272_v34 = vld [vmem:[#allocation5 + $0x4f8] sm:$0xff] }
 0x118   :  { %3288 = vmatpush1.bf16.msra.mxu0 %v5026_v33  ;;  %v268_v33 = vld [vmem:[#allocation5 + $0x4d8] sm:$0xff] }
 0x119   :  { %3289 = vmatprep.subr.bf16.mxu0 %v5034_v8  ;;  %1592 = vmatpush1.bf16.msra.mxu1 %v4382_v35  ;;  %v4486_v8 = vcombine.low %v260_v28, %v264_v29  ;;  %v4495_v35 = vcombine.high %v268_v33, %v272_v34 }
 0x11a   :  { %1593 = vmatprep.subr.bf16.mxu1 %v4391_v38  ;;  %v4503_v38 = vcombine.high %v276_v41, %v280_v36  ;;  %v5053_v36 = vld [vmem:[#allocation7 + $0x108] ss:$16 sps:$4 sm:$0xff]  }
 0x11c   :  { %3290 = vmatpush1.bf16.msra.mxu0 %v5032_v37  ;;  %v4494_v37 = vcombine.low %v268_v33, %v272_v34 }
 0x11d   :  { %3291 = vmatprep.subr.bf16.mxu0 %v5040_v39  ;;  %1594 = vmatpush1.bf16.msra.mxu1 %v4390_v40  ;;  %v284_v39 = vld [vmem:[#allocation5 + $0x558] sm:$0xff] }
 0x11e   :  { %1595 = vmatprep.subr.bf16.mxu1 %v4399_v45  ;;  %v288_v40 = vld [vmem:[#allocation5 + $0x578] sm:$0xff] }
 0x11f   :  { %v4510_v45 = vcombine.low %v284_v39, %v288_v40 }
 0x120   :  { %3292 = vmatpush1.bf16.msra.mxu0 %v5038_v44  ;;  %v296_v44 = vld [vmem:[#allocation5 + $0x5b8] sm:$0xff] }
 0x121   :  { %3293 = vmatprep.subr.bf16.mxu0 %v5046_v20  ;;  %1596 = vmatpush1.bf16.msra.mxu1 %v4398_v46  ;;  %v4519_v20 = vcombine.high %v292_v43, %v296_v44  ;;  %v300_v46 = vld [vmem:[#allocation5 + $0x5d8] sm:$0xff]  ;;  %v4518_v48 = vcombine.low %v292_v43, %v296_v44  ;;  %v5083_v44 = vld [vmem:[#allocation7 + $0x220] ss:$16 sps:$4 sm:$0xff]  }
 0x122   :  { %1597 = vmatprep.subr.bf16.mxu1 %v4407_v50  ;;  %v4526_v50 = vcombine.low %v300_v46, %v304_v47  ;;  %v5061_v43 = vld [vmem:[#allocation7 + $0x14c] ss:$16 sps:$4 sm:$0xff]  }
 0x124   :  { %3294 = vmatpush1.bf16.msra.mxu0 %v5044_v49  ;;  %v4527_v49 = vcombine.high %v300_v46, %v304_v47  ;;  %v5064_v46 = vld [vmem:[#allocation7 + $0x16c] ss:$16 sps:$4 sm:$0xff]   ;;  %v5089_v47 = vld [vmem:[#allocation7 + $0x240] ss:$16 sps:$4 sm:$0xff]  }
 0x125   :  { %3295 = vmatprep.subr.bf16.mxu0 %v5052_v51  ;;  %1598 = vmatpush1.bf16.msra.mxu1 %v4406_v52  ;;  %v5007_v52 = vld [vmem:[#allocation7 + $0xc] ss:$16 sps:$4 sm:$0xff]  }
 0x126   :  { %1599 = vmatprep.subr.bf16.mxu1 %v4415_v55 }
 0x128   :  { %3296 = vmatpush1.bf16.msra.mxu0 %v5050_v56  ;;  %v5005_v56 = vld [vmem:[#allocation7 + $0x8] ss:$16 sps:$4 sm:$0xff]  }
 0x129   :  { %3308 = vmatprep.subr.bf16.mxu0 %v5079_v57  ;;  %1600 = vmatpush1.bf16.msra.mxu1 %v4414_v58  ;;  %v5013_v57 = vld [vmem:[#allocation7 + $0x2c] ss:$16 sps:$4 sm:$0xff]   ;;  %v5011_v58 = vld [vmem:[#allocation7 + $0x28] ss:$16 sps:$4 sm:$0xff]  }
 0x12a   :  { %1601 = vmatprep.subr.bf16.mxu1 %v4423_v60  ;;  %v307_v60 = vlaneseq }
 0x12c   :  { %v5757_v63 = vshrl.u32 %v307_v60, 7  ;;  %v5115_v60 = vld [vmem:[#allocation7 + $0x2c4] ss:$16 sps:$4 sm:$0xff]  }
 0x12d   :  { %1602 = vmatpush1.bf16.msra.mxu1 %v4422_v62  ;;  %v5025_v62 = vld [vmem:[#allocation7 + $0x6c] ss:$16 sps:$4 sm:$0xff]  }
 0x12e   :  { %1603 = vmatprep.subr.bf16.mxu1 %v4431_v0  ;;  %v5023_v0 = vld [vmem:[#allocation7 + $0x68] ss:$16 sps:$4 sm:$0xff]  }
 0x131   :  { %1604 = vmatpush1.bf16.msra.mxu1 %v4430_v3  ;;  %v5760_v3 = vsub.s32 0, %v5757_v63 }
 0x132   :  { %1605 = vmatprep.subr.bf16.mxu1 %v4439_v5  ;;  %v5768_v5 = vsub.s32 1, %v5757_v63 }
 0x134   :  { %v314_v10 = vrot.slane %v5765_v4, %v5768_v5 }
 0x135   :  { %1606 = vmatpush1.bf16.msra.mxu1 %v4438_v7  ;;  %v310_v7 = vrot.slane %v5765_v4, %v5760_v3 }
 0x136   :  { %1607 = vmatprep.subr.bf16.mxu1 %v4447_v11  ;;  %v5035_v11 = vld [vmem:[#allocation7 + $0xa8] ss:$16 sps:$4 sm:$0xff]  }
 0x139   :  { %1608 = vmatpush1.bf16.msra.mxu1 %v4446_v13 }
 0x13a   :  { %1609 = vmatprep.subr.bf16.mxu1 %v4455_v14 }
 0x13d   :  { %1610 = vmatpush1.bf16.msra.mxu1 %v4454_v17 }
 0x13e   :  { %1611 = vmatprep.subr.bf16.mxu1 %v4463_v18  ;;  %v5041_v18 = vld [vmem:[#allocation7 + $0xc8] ss:$16 sps:$4 sm:$0xff]  }
 0x141   :  { %1612 = vmatpush1.bf16.msra.mxu1 %v4462_v22 }
 0x142   :  { %1624 = vmatprep.subr.bf16.mxu1 %v4471_v23  ;;  %v5049_v23 = vld [vmem:[#allocation7 + $0xec] ss:$16 sps:$4 sm:$0xff]  }
 0x144   :  { %1614 = vmatmul.mubr.bf16.vlgmr.msra.gmra.mrb[8].mxu1 %v5479_v30  ;;  %v5047_v30 = vld [vmem:[#allocation7 + $0xe8] ss:$16 sps:$4 sm:$0xff]  }
 0x145   :  { %1625 = vmatpush1.bf16.msra.mxu1 %v4470_v26  ;;  %1656 = vmatprep.mubr.bf16.mxu1 %v5611_v1  ;;  %v4511_v1 = vcombine.high %v284_v39, %v288_v40  ;;  %v5058_v39 = vld [vmem:[#allocation7 + $0x12c] ss:$16 sps:$4 sm:$0xff]   ;;  %v5077_v40 = vld [vmem:[#allocation7 + $0x200] ss:$16 sps:$4 sm:$0xff]  }
 0x146   :  { %1626 = vmatprep.subr.bf16.mxu1 %v4479_v27 }
 0x149   :  { %1627 = vmatpush1.bf16.msra.mxu1 %v4478_v31 }
 0x14a   :  { %1628 = vmatprep.subr.bf16.mxu1 %v4487_v32  ;;  %v5055_v32 = vld [vmem:[#allocation7 + $0x10c] ss:$16 sps:$4 sm:$0xff]  }
 0x14d   :  { %1629 = vmatpush1.bf16.msra.mxu1 %v4486_v8 }
 0x14e   :  { %1630 = vmatprep.subr.bf16.mxu1 %v4495_v35 }
 0x151   :  { %1631 = vmatpush1.bf16.msra.mxu1 %v4494_v37 }
 0x152   :  { %1632 = vmatprep.subr.bf16.mxu1 %v4503_v38 }
 0x155   :  { %1633 = vmatpush1.bf16.msra.mxu1 %v4502_v42  ;;  %v5085_v42 = vld [vmem:[#allocation7 + $0x224] ss:$16 sps:$4 sm:$0xff]  }
 0x156   :  { %1634 = vmatprep.subr.bf16.mxu1 %v4511_v1  ;;  %v5056_v1 = vld [vmem:[#allocation7 + $0x128] ss:$16 sps:$4 sm:$0xff]  }
 0x159   :  { %1635 = vmatpush1.bf16.msra.mxu1 %v4510_v45  ;;  %v5091_v45 = vld [vmem:[#allocation7 + $0x244] ss:$16 sps:$4 sm:$0xff]  }
 0x15a   :  { %1636 = vmatprep.subr.bf16.mxu1 %v4519_v20  ;;  %v5059_v20 = vld [vmem:[#allocation7 + $0x148] ss:$16 sps:$4 sm:$0xff]  }
 0x15d   :  { %1637 = vmatpush1.bf16.msra.mxu1 %v4518_v48  ;;  %v5097_v48 = vld [vmem:[#allocation7 + $0x264] ss:$16 sps:$4 sm:$0xff]  }
 0x15e   :  { %v1400_v51 = vpop.f32.mrb[0].mxu0  ;;  %1638 = vmatprep.subr.bf16.mxu1 %v4527_v49  ;;  %v5062_v49 = vld [vmem:[#allocation7 + $0x168] ss:$16 sps:$4 sm:$0xff]  }
 0x15f   :  { %v1402_v53 = vpop.f32.mrb[1].mxu0 }
 0x160   :  { %v1404_v54 = vpop.f32.mrb[2].mxu0 }
 0x161   :  { %v1406_v55 = vpop.f32.mrb[3].mxu0  ;;  %1639 = vmatpush1.bf16.msra.mxu1 %v4526_v50  ;;  %v5067_v50 = vld [vmem:[#allocation7 + $0x18c] ss:$16 sps:$4 sm:$0xff]  }
 0x162   :  { %3437 = vmatprep.subr.bf16.mxu1 %v5007_v52  ;;  %v5103_v52 = vld [vmem:[#allocation7 + $0x284] ss:$16 sps:$4 sm:$0xff]  }
 0x164   :  { %1657 = vmatmul.mubr.bf16.vlgmr.msra.gmra.mrb[8].mxu1 %v5752_v9  ;;  %v5029_v9 = vld [vmem:[#allocation7 + $0x88] ss:$16 sps:$4 sm:$0xff]  }
 0x165   :  { %3438 = vmatpush1.bf16.msra.mxu1 %v5005_v56  ;;  %v5109_v56 = vld [vmem:[#allocation7 + $0x2a4] ss:$16 sps:$4 sm:$0xff]  }
 0x166   :  { %3439 = vmatprep.subr.bf16.mxu1 %v5013_v57  ;;  %v5068_v57 = vld [vmem:[#allocation7 + $0x1a8] ss:$16 sps:$4 sm:$0xff]  }
 0x169   :  { %3440 = vmatpush1.bf16.msra.mxu1 %v5011_v58  ;;  %v5073_v58 = vld [vmem:[#allocation7 + $0x1cc] ss:$16 sps:$4 sm:$0xff]  }
 0x16a   :  { %3441 = vmatprep.subr.bf16.mxu1 %v5019_v59  ;;  %v5107_v59 = vld [vmem:[#allocation7 + $0x2a0] ss:$16 sps:$4 sm:$0xff]  }
 0x16d   :  { %3442 = vmatpush1.bf16.msra.mxu1 %v5017_v61  ;;  %v5071_v61 = vld [vmem:[#allocation7 + $0x1c8] ss:$16 sps:$4 sm:$0xff]  }
 0x16e   :  { %3443 = vmatprep.subr.bf16.mxu1 %v5025_v62  ;;  %v5076_v62 = vld [vmem:[#allocation7 + $0x1ec] ss:$16 sps:$4 sm:$0xff]  }
 0x171   :  { %3444 = vmatpush1.bf16.msra.mxu1 %v5023_v0  ;;  %v5113_v0 = vld [vmem:[#allocation7 + $0x2c0] ss:$16 sps:$4 sm:$0xff]  }
 0x172   :  { %3445 = vmatprep.subr.bf16.mxu1 %v5031_v2  ;;  %v5121_v2 = vld [vmem:[#allocation7 + $0x2e4] ss:$16 sps:$4 sm:$0xff]  }
 0x175   :  { %3446 = vmatpush1.bf16.msra.mxu1 %v5029_v9  ;;  %v5074_v9 = vld [vmem:[#allocation7 + $0x1e8] ss:$16 sps:$4 sm:$0xff]  }
 0x176   :  { %3447 = vmatprep.subr.bf16.mxu1 %v5037_v6  ;;  %v5082_v6 = vld [vmem:[#allocation7 + $0x20c] ss:$16 sps:$4 sm:$0xff]  }
 0x177   :  { %v1357_v13 = vpop.f32.mrb[0].mxu1 }
 0x178   :  { %v1358_v14 = vadd.f32 %v1357_v13, %v310_v7  ;;  %v1359_v15 = vpop.f32.mrb[1].mxu1  ;;  %v5125_v13 = vld [vmem:[#allocation7 + $0x300] ss:$16 sps:$4 sm:$0xff]  }
 0x179   :  { %v1360_v16 = vadd.f32 %v1359_v15, %v314_v10  ;;  %v1361_v17 = vpop.f32.mrb[2].mxu1  ;;  %3448 = vmatpush1.bf16.msra.mxu1 %v5035_v11  ;;  %v5080_v11 = vld [vmem:[#allocation7 + $0x208] ss:$16 sps:$4 sm:$0xff]  }
 0x17a   :  { %v1362_v19 = vadd.f32 %v1361_v17, %v310_v7  ;;  %v1401_v21 = vadd.f32 %v1400_v51, %v1358_v14  ;;  %v1363_v22 = vpop.f32.mrb[3].mxu1  ;;  %3449 = vmatprep.subr.bf16.mxu1 %v5043_v12  ;;  %v5095_v51 = vld [vmem:[#allocation7 + $0x260] ss:$16 sps:$4 sm:$0xff]   ;;  %v5088_v12 = vld [vmem:[#allocation7 + $0x22c] ss:$16 sps:$4 sm:$0xff]  }
 0x17b   :  { %v1364_v24 = vadd.f32 %v1363_v22, %v314_v10  ;;  %v1403_v25 = vadd.f32 %v1402_v53, %v1360_v16  ;;  %v5065_v53 = vld [vmem:[#allocation7 + $0x188] ss:$16 sps:$4 sm:$0xff]   ;;  %v5119_v7 = vld [vmem:[#allocation7 + $0x2e0] ss:$16 sps:$4 sm:$0xff]   ;;  %v5127_v10 = vld [vmem:[#allocation7 + $0x304] ss:$16 sps:$4 sm:$0xff]  }
 0x17c   :  { %v1667_v26 = vmul.f32 0.01, %v1401_v21  ;;  %v1405_v27 = vadd.f32 %v1404_v54, %v1362_v19  ;;  %v5070_v54 = vld [vmem:[#allocation7 + $0x1ac] ss:$16 sps:$4 sm:$0xff]   ;;  %v5133_v14 = vld [vmem:[#allocation7 + $0x324] ss:$16 sps:$4 sm:$0xff]  }
 0x17d   :  { %v1668_v28 = vmul.f32 0.01, %v1403_v25  ;;  %v1407_v29 = vadd.f32 %v1406_v55, %v1364_v24  ;;  %3450 = vmatpush1.bf16.msra.mxu1 %v5041_v18  ;;  %v5101_v55 = vld [vmem:[#allocation7 + $0x280] ss:$16 sps:$4 sm:$0xff]   ;;  %v5086_v15 = vld [vmem:[#allocation7 + $0x228] ss:$16 sps:$4 sm:$0xff]  }
 0x17e   :  { %v1675_v31 = vmul.f32 0.01, %v1405_v27  ;;  %3451 = vmatprep.subr.bf16.mxu1 %v5049_v23  ;;  %v1683_v34 = vmax.f32 %v1401_v21, %v1667_v26  ;;  %v5094_v16 = vld [vmem:[#allocation7 + $0x24c] ss:$16 sps:$4 sm:$0xff]   ;;  %v5131_v17 = vld [vmem:[#allocation7 + $0x320] ss:$16 sps:$4 sm:$0xff]  }
 0x17f   :  { %v1676_v33 = vmul.f32 0.01, %v1407_v29  ;;  %v1684_v35 = vmax.f32 %v1403_v25, %v1668_v28  ;;  %v5139_v18 = vld [vmem:[#allocation7 + $0x344] ss:$16 sps:$4 sm:$0xff]   ;;  %v5092_v19 = vld [vmem:[#allocation7 + $0x248] ss:$16 sps:$4 sm:$0xff]  }
 0x180   :  { %v1691_v8 = vmax.f32 %v1405_v27, %v1675_v31  ;;  %v5100_v21 = vld [vmem:[#allocation7 + $0x26c] ss:$16 sps:$4 sm:$0xff]   ;;  %v5137_v22 = vld [vmem:[#allocation7 + $0x340] ss:$16 sps:$4 sm:$0xff]   ;;  %v5145_v23 = vld [vmem:[#allocation7 + $0x364] ss:$16 sps:$4 sm:$0xff]  }
 0x181   :  { %v1692_v41 = vmax.f32 %v1407_v29, %v1676_v33  ;;  %3452 = vmatpush1.bf16.msra.mxu1 %v5047_v30  ;;  %v5098_v24 = vld [vmem:[#allocation7 + $0x268] ss:$16 sps:$4 sm:$0xff]   ;;  %v5106_v25 = vld [vmem:[#allocation7 + $0x28c] ss:$16 sps:$4 sm:$0xff]   ;;  %v5143_v26 = vld [vmem:[#allocation7 + $0x360] ss:$16 sps:$4 sm:$0xff]  }
 0x182   :  { %v5774_v37 = vpack.c.bf16 %v1691_v8, %v1683_v34  ;;  %3453 = vmatprep.subr.bf16.mxu1 %v5055_v32  ;;  %v5151_v27 = vld [vmem:[#allocation7 + $0x384] ss:$16 sps:$4 sm:$0xff]   ;;  %v5104_v28 = vld [vmem:[#allocation7 + $0x288] ss:$16 sps:$4 sm:$0xff]   ;;  %v5112_v29 = vld [vmem:[#allocation7 + $0x2ac] ss:$16 sps:$4 sm:$0xff]  }
 0x183   :  { %v1700_v38 = vpack.c.bf16 %v1692_v41, %v1684_v35  ;;  %v5149_v30 = vld [vmem:[#allocation7 + $0x380] ss:$16 sps:$4 sm:$0xff]   ;;  %v5157_v31 = vld [vmem:[#allocation7 + $0x3a4] ss:$16 sps:$4 sm:$0xff]   ;;  %v5110_v32 = vld [vmem:[#allocation7 + $0x2a8] ss:$16 sps:$4 sm:$0xff]  }
 0x184   :  { %v5118_v33 = vld [vmem:[#allocation7 + $0x2cc] ss:$16 sps:$4 sm:$0xff]   ;;  %v325_v34 = vsub.s32 4, %v5757_v63  ;;  %v5155_v8 = vld [vmem:[#allocation7 + $0x3a0] ss:$16 sps:$4 sm:$0xff]   ;;  %v329_v35 = vsub.s32 5, %v5757_v63 }
 0x185   :  { %3297 = vmatprep.mubr.bf16.mxu0 %v1700_v38  ;;  %3454 = vmatpush1.bf16.msra.mxu1 %v5053_v36  ;;  %v5163_v41 = vld [vmem:[#allocation7 + $0x3c4] ss:$16 sps:$4 sm:$0xff]   ;;  %v5116_v36 = vld [vmem:[#allocation7 + $0x2c8] ss:$16 sps:$4 sm:$0xff]  }
 0x186   :  { %3469 = vmatprep.mubr.bf16.mxu1 %v1700_v38  ;;  %3298 = vmatmul.mubr.bf16.vlgmr.msra.gmra.mrb[8].mxu0 %v5774_v37  ;;  %v326_v38 = vrot.slane %v5765_v4, %v325_v34 }
 0x187   :  { %3455 = vmatprep.subr.bf16.mxu1 %v5058_v39  ;;  %3309 = vmatpush1.bf16.msra.mxu0 %v5077_v40  ;;  %v5161_v39 = vld [vmem:[#allocation7 + $0x3c0] ss:$16 sps:$4 sm:$0xff]   ;;  %v330_v40 = vrot.slane %v5765_v4, %v329_v35  ;;  %v5170_v35 = vld [vmem:[#allocation7 + $0x3e8] ss:$16 sps:$4 sm:$0xff]  }
 0x188   :  { %3310 = vmatprep.subr.bf16.mxu0 %v5085_v42  ;;  %v5169_v42 = vld [vmem:[#allocation7 + $0x3e4] ss:$16 sps:$4 sm:$0xff]  }
 0x189   :  { %3456 = vmatpush1.bf16.msra.mxu1 %v5056_v1  ;;  %v5122_v1 = vld [vmem:[#allocation7 + $0x2e8] ss:$16 sps:$4 sm:$0xff]  }
 0x18a   :  { %3457 = vmatprep.subr.bf16.mxu1 %v5061_v43 }
 0x18b   :  { %3311 = vmatpush1.bf16.msra.mxu0 %v5083_v44  ;;  %v5130_v44 = vld [vmem:[#allocation7 + $0x30c] ss:$16 sps:$4 sm:$0xff]  }
 0x18c   :  { %3312 = vmatprep.subr.bf16.mxu0 %v5091_v45 }
 0x18d   :  { %3458 = vmatpush1.bf16.msra.mxu1 %v5059_v20 }
 0x18e   :  { %3459 = vmatprep.subr.bf16.mxu1 %v5064_v46  ;;  %v5167_v46 = vld [vmem:[#allocation7 + $0x3e0] ss:$16 sps:$4 sm:$0xff]  }
 0x18f   :  { %3313 = vmatpush1.bf16.msra.mxu0 %v5089_v47 }
 0x190   :  { %3314 = vmatprep.subr.bf16.mxu0 %v5097_v48 }
 0x191   :  { %3460 = vmatpush1.bf16.msra.mxu1 %v5062_v49  ;;  %v5175_v49 = vld [vmem:[#allocation7 + $0x404] ss:$16 sps:$4 sm:$0xff]  }
 0x192   :  { %3461 = vmatprep.subr.bf16.mxu1 %v5067_v50 }
 0x193   :  { %3315 = vmatpush1.bf16.msra.mxu0 %v5095_v51 }
 0x194   :  { %3316 = vmatprep.subr.bf16.mxu0 %v5103_v52 }
 0x195   :  { %3462 = vmatpush1.bf16.msra.mxu1 %v5065_v53  ;;  %v5128_v53 = vld [vmem:[#allocation7 + $0x308] ss:$16 sps:$4 sm:$0xff]  }
 0x196   :  { %3463 = vmatprep.subr.bf16.mxu1 %v5070_v54 }
 0x197   :  { %3317 = vmatpush1.bf16.msra.mxu0 %v5101_v55 }
 0x198   :  { %3318 = vmatprep.subr.bf16.mxu0 %v5109_v56  ;;  %v5136_v56 = vld [vmem:[#allocation7 + $0x32c] ss:$16 sps:$4 sm:$0xff]  }
 0x199   :  { %3464 = vmatpush1.bf16.msra.mxu1 %v5068_v57 }
 0x19a   :  { %3465 = vmatprep.subr.bf16.mxu1 %v5073_v58 }
 0x19b   :  { %3319 = vmatpush1.bf16.msra.mxu0 %v5107_v59 }
 0x19c   :  { %3320 = vmatprep.subr.bf16.mxu0 %v5115_v60 }
 0x19d   :  { %3466 = vmatpush1.bf16.msra.mxu1 %v5071_v61 }
 0x19e   :  { %3467 = vmatprep.subr.bf16.mxu1 %v5076_v62  ;;  %v5134_v62 = vld [vmem:[#allocation7 + $0x328] ss:$16 sps:$4 sm:$0xff]  }
 0x19f   :  { %3321 = vmatpush1.bf16.msra.mxu0 %v5113_v0 }
 0x1a0   :  { %3322 = vmatprep.subr.bf16.mxu0 %v5121_v2  ;;  %v5142_v2 = vld [vmem:[#allocation7 + $0x34c] ss:$16 sps:$4 sm:$0xff]  }
 0x1a1   :  { %3468 = vmatpush1.bf16.msra.mxu1 %v5074_v9 }
 0x1a2   :  { %3480 = vmatprep.subr.bf16.mxu1 %v5082_v6 }
 0x1a3   :  { %3323 = vmatpush1.bf16.msra.mxu0 %v5119_v7  ;;  %v5140_v7 = vld [vmem:[#allocation7 + $0x348] ss:$16 sps:$4 sm:$0xff]  }
 0x1a4   :  { %3470 = vmatmul.mubr.bf16.vlgmr.msra.gmra.mrb[12].mxu1 %v5774_v37  ;;  %3324 = vmatprep.subr.bf16.mxu0 %v5127_v10  ;;  %v5124_v37 = vld [vmem:[#allocation7 + $0x2ec] ss:$16 sps:$4 sm:$0xff]  }
 0x1a5   :  { %3481 = vmatpush1.bf16.msra.mxu1 %v5080_v11  ;;  %v5148_v10 = vld [vmem:[#allocation7 + $0x36c] ss:$16 sps:$4 sm:$0xff]   ;;  %v5146_v11 = vld [vmem:[#allocation7 + $0x368] ss:$16 sps:$4 sm:$0xff]  }
 0x1a6   :  { %3482 = vmatprep.subr.bf16.mxu1 %v5088_v12  ;;  %v5154_v12 = vld [vmem:[#allocation7 + $0x38c] ss:$16 sps:$4 sm:$0xff]  }
 0x1a7   :  { %3325 = vmatpush1.bf16.msra.mxu0 %v5125_v13  ;;  %v317_v13 = vsub.s32 2, %v5757_v63 }
 0x1a8   :  { %3326 = vmatprep.subr.bf16.mxu0 %v5133_v14  ;;  %v5152_v14 = vld [vmem:[#allocation7 + $0x388] ss:$16 sps:$4 sm:$0xff]  }
 0x1a9   :  { %3483 = vmatpush1.bf16.msra.mxu1 %v5086_v15  ;;  %v321_v15 = vsub.s32 3, %v5757_v63 }
 0x1aa   :  { %3484 = vmatprep.subr.bf16.mxu1 %v5094_v16  ;;  %v5160_v16 = vld [vmem:[#allocation7 + $0x3ac] ss:$16 sps:$4 sm:$0xff]  }
 0x1ab   :  { %3327 = vmatpush1.bf16.msra.mxu0 %v5131_v17  ;;  %v318_v17 = vrot.slane %v5765_v4, %v317_v13 }
 0x1ac   :  { %3328 = vmatprep.subr.bf16.mxu0 %v5139_v18  ;;  %v322_v18 = vrot.slane %v5765_v4, %v321_v15 }
 0x1ad   :  { %3485 = vmatpush1.bf16.msra.mxu1 %v5092_v19  ;;  %v5158_v19 = vld [vmem:[#allocation7 + $0x3a8] ss:$16 sps:$4 sm:$0xff]  }
 0x1ae   :  { %3486 = vmatprep.subr.bf16.mxu1 %v5100_v21  ;;  %v5166_v21 = vld [vmem:[#allocation7 + $0x3cc] ss:$16 sps:$4 sm:$0xff]  }
 0x1af   :  { %3329 = vmatpush1.bf16.msra.mxu0 %v5137_v22 }
 0x1b0   :  { %3330 = vmatprep.subr.bf16.mxu0 %v5145_v23 }
 0x1b1   :  { %3487 = vmatpush1.bf16.msra.mxu1 %v5098_v24 }
 0x1b2   :  { %3488 = vmatprep.subr.bf16.mxu1 %v5106_v25 }
 0x1b3   :  { %3331 = vmatpush1.bf16.msra.mxu0 %v5143_v26 }
 0x1b4   :  { %3332 = vmatprep.subr.bf16.mxu0 %v5151_v27  ;;  %v5164_v27 = vld [vmem:[#allocation7 + $0x3c8] ss:$16 sps:$4 sm:$0xff]  }
 0x1b5   :  { %3489 = vmatpush1.bf16.msra.mxu1 %v5104_v28 }
 0x1b6   :  { %3490 = vmatprep.subr.bf16.mxu1 %v5112_v29 }
 0x1b7   :  { %3333 = vmatpush1.bf16.msra.mxu0 %v5149_v30 }
 0x1b8   :  { %3334 = vmatprep.subr.bf16.mxu0 %v5157_v31  ;;  %v5172_v31 = vld [vmem:[#allocation7 + $0x3ec] ss:$16 sps:$4 sm:$0xff]  }
 0x1b9   :  { %3491 = vmatpush1.bf16.msra.mxu1 %v5110_v32 }
 0x1ba   :  { %3492 = vmatprep.subr.bf16.mxu1 %v5118_v33 }
 0x1bb   :  { %3335 = vmatpush1.bf16.msra.mxu0 %v5155_v8 }
 0x1bc   :  { %3336 = vmatprep.subr.bf16.mxu0 %v5163_v41 }
 0x1bd   :  { %3493 = vmatpush1.bf16.msra.mxu1 %v5116_v36 }
 0x1be   :  { %v1572_v43 = vpop.f32.mrb[4].mxu0  ;;  %3494 = vmatprep.subr.bf16.mxu1 %v5124_v37  ;;  %v5178_v37 = vld [vmem:[#allocation7 + $0x40c] ss:$16 sps:$4 sm:$0xff]  }
 0x1bf   :  { %v4901_v45 = vadd.f32 %v1572_v43, %v326_v38  ;;  %v1574_v20 = vpop.f32.mrb[5].mxu0  ;;  %3337 = vmatpush1.bf16.msra.mxu0 %v5161_v39  ;;  %v5176_v43 = vld [vmem:[#allocation7 + $0x408] ss:$16 sps:$4 sm:$0xff]  }
 0x1c0   :  { %v4902_v47 = vadd.f32 %v1574_v20, %v330_v40  ;;  %v1576_v48 = vpop.f32.mrb[6].mxu0  ;;  %3338 = vmatprep.subr.bf16.mxu0 %v5169_v42  ;;  %v5179_v20 = vld [vmem:[#allocation7 + $0x420] ss:$16 sps:$4 sm:$0xff]  }
 0x1c1   :  { %v1671_v50 = vmul.f32 0.01, %v4901_v45  ;;  %v4903_v51 = vadd.f32 %v1576_v48, %v326_v38  ;;  %v1578_v52 = vpop.f32.mrb[7].mxu0  ;;  %3495 = vmatpush1.bf16.msra.mxu1 %v5122_v1  ;;  %v5173_v1 = vld [vmem:[#allocation7 + $0x400] ss:$16 sps:$4 sm:$0xff]  }
 0x1c2   :  { %v1672_v54 = vmul.f32 0.01, %v4902_v47  ;;  %v4904_v55 = vadd.f32 %v1578_v52, %v330_v40  ;;  %3496 = vmatprep.subr.bf16.mxu1 %v5130_v44  ;;  %v5181_v44 = vld [vmem:[#allocation7 + $0x424] ss:$16 sps:$4 sm:$0xff]   ;;  %v5190_v48 = vld [vmem:[#allocation7 + $0x44c] ss:$16 sps:$4 sm:$0xff]  }
 0x1c3   :  { %v1687_v57 = vmax.f32 %v4901_v45, %v1671_v50  ;;  %v1679_v58 = vmul.f32 0.01, %v4903_v51  ;;  %3339 = vmatpush1.bf16.msra.mxu0 %v5167_v46  ;;  %v5184_v45 = vld [vmem:[#allocation7 + $0x42c] ss:$16 sps:$4 sm:$0xff]   ;;  %v5182_v46 = vld [vmem:[#allocation7 + $0x428] ss:$16 sps:$4 sm:$0xff]  }
 0x1c4   :  { %v1688_v59 = vmax.f32 %v4902_v47, %v1672_v54  ;;  %v1680_v60 = vmul.f32 0.01, %v4904_v55  ;;  %3351 = vmatprep.subr.bf16.mxu0 %v5175_v49  ;;  %v5187_v47 = vld [vmem:[#allocation7 + $0x444] ss:$16 sps:$4 sm:$0xff]   ;;  %v5185_v49 = vld [vmem:[#allocation7 + $0x440] ss:$16 sps:$4 sm:$0xff]  }
 0x1c5   :  { %v1695_v61 = vmax.f32 %v4903_v51, %v1679_v58  ;;  %3497 = vmatpush1.bf16.msra.mxu1 %v5128_v53  ;;  %v5188_v50 = vld [vmem:[#allocation7 + $0x448] ss:$16 sps:$4 sm:$0xff]   ;;  %v5193_v51 = vld [vmem:[#allocation7 + $0x464] ss:$16 sps:$4 sm:$0xff]   ;;  %v5196_v52 = vld [vmem:[#allocation7 + $0x46c] ss:$16 sps:$4 sm:$0xff]  }
 0x1c6   :  { %v1696_v0 = vmax.f32 %v4904_v55, %v1680_v60  ;;  %3498 = vmatprep.subr.bf16.mxu1 %v5136_v56  ;;  %v5191_v53 = vld [vmem:[#allocation7 + $0x460] ss:$16 sps:$4 sm:$0xff]   ;;  %v5194_v54 = vld [vmem:[#allocation7 + $0x468] ss:$16 sps:$4 sm:$0xff]   ;;  %v5199_v55 = vld [vmem:[#allocation7 + $0x484] ss:$16 sps:$4 sm:$0xff]  }
 0x1c7   :  { %v5782_v9 = vpack.c.bf16 %v1695_v61, %v1687_v57  ;;  %v5202_v56 = vld [vmem:[#allocation7 + $0x48c] ss:$16 sps:$4 sm:$0xff]   ;;  %v5197_v57 = vld [vmem:[#allocation7 + $0x480] ss:$16 sps:$4 sm:$0xff]   ;;  %v5200_v58 = vld [vmem:[#allocation7 + $0x488] ss:$16 sps:$4 sm:$0xff]  }
 0x1c8   :  { %v5784_v6 = vpack.c.bf16 %v1696_v0, %v1688_v59  ;;  %v5205_v59 = vld [vmem:[#allocation7 + $0x4a4] ss:$16 sps:$4 sm:$0xff]   ;;  %v5208_v60 = vld [vmem:[#allocation7 + $0x4ac] ss:$16 sps:$4 sm:$0xff]   ;;  %v5203_v61 = vld [vmem:[#allocation7 + $0x4a0] ss:$16 sps:$4 sm:$0xff]  }
 0x1c9   :  { %3499 = vmatpush1.bf16.msra.mxu1 %v5134_v62  ;;  %v5206_v62 = vld [vmem:[#allocation7 + $0x4a8] ss:$16 sps:$4 sm:$0xff]   ;;  %v5211_v0 = vld [vmem:[#allocation7 + $0x4c4] ss:$16 sps:$4 sm:$0xff]  }
 0x1ca   :  { %3500 = vmatprep.subr.bf16.mxu1 %v5142_v2  ;;  %v5214_v2 = vld [vmem:[#allocation7 + $0x4cc] ss:$16 sps:$4 sm:$0xff]  }
 0x1cd   :  { %3501 = vmatpush1.bf16.msra.mxu1 %v5140_v7  ;;  %v5212_v7 = vld [vmem:[#allocation7 + $0x4c8] ss:$16 sps:$4 sm:$0xff]  }
 0x1ce   :  { %3502 = vmatprep.subr.bf16.mxu1 %v5148_v10  ;;  %v5217_v10 = vld [vmem:[#allocation7 + $0x4e4] ss:$16 sps:$4 sm:$0xff]  }
 0x1d1   :  { %3503 = vmatpush1.bf16.msra.mxu1 %v5146_v11  ;;  %v5220_v11 = vld [vmem:[#allocation7 + $0x4ec] ss:$16 sps:$4 sm:$0xff]  }
 0x1d2   :  { %3504 = vmatprep.subr.bf16.mxu1 %v5154_v12  ;;  %v5215_v12 = vld [vmem:[#allocation7 + $0x4e0] ss:$16 sps:$4 sm:$0xff]  }
 0x1d5   :  { %3505 = vmatpush1.bf16.msra.mxu1 %v5152_v14  ;;  %v5218_v14 = vld [vmem:[#allocation7 + $0x4e8] ss:$16 sps:$4 sm:$0xff]  }
 0x1d6   :  { %3506 = vmatprep.subr.bf16.mxu1 %v5160_v16  ;;  %v5223_v16 = vld [vmem:[#allocation7 + $0x504] ss:$16 sps:$4 sm:$0xff]  }
 0x1d7   :  { %v1486_v22 = vpop.f32.mrb[4].mxu1 }
 0x1d8   :  { %v4897_v23 = vadd.f32 %v1486_v22, %v318_v17  ;;  %v1488_v24 = vpop.f32.mrb[5].mxu1  ;;  %v5232_v22 = vld [vmem:[#allocation7 + $0x52c] ss:$16 sps:$4 sm:$0xff]  }
 0x1d9   :  { %v4898_v25 = vadd.f32 %v1488_v24, %v322_v18  ;;  %v1490_v26 = vpop.f32.mrb[6].mxu1  ;;  %3507 = vmatpush1.bf16.msra.mxu1 %v5158_v19  ;;  %v5224_v19 = vld [vmem:[#allocation7 + $0x508] ss:$16 sps:$4 sm:$0xff]  }
 0x1da   :  { %v1669_v28 = vmul.f32 0.01, %v4897_v23  ;;  %v4899_v29 = vadd.f32 %v1490_v26, %v318_v17  ;;  %v1492_v30 = vpop.f32.mrb[7].mxu1  ;;  %3508 = vmatprep.subr.bf16.mxu1 %v5166_v21  ;;  %v5226_v17 = vld [vmem:[#allocation7 + $0x50c] ss:$16 sps:$4 sm:$0xff]  }
 0x1db   :  { %v1670_v32 = vmul.f32 0.01, %v4898_v25  ;;  %v4900_v33 = vadd.f32 %v1492_v30, %v322_v18  ;;  %v5221_v18 = vld [vmem:[#allocation7 + $0x500] ss:$16 sps:$4 sm:$0xff]   ;;  %v5229_v21 = vld [vmem:[#allocation7 + $0x524] ss:$16 sps:$4 sm:$0xff]  }
 0x1dc   :  { %v1677_v34 = vmul.f32 0.01, %v4899_v29  ;;  %v1685_v41 = vmax.f32 %v4897_v23, %v1669_v28  ;;  %v5227_v23 = vld [vmem:[#allocation7 + $0x520] ss:$16 sps:$4 sm:$0xff]   ;;  %v5230_v24 = vld [vmem:[#allocation7 + $0x528] ss:$16 sps:$4 sm:$0xff]  }
 0x1dd   :  { %v1678_v8 = vmul.f32 0.01, %v4900_v33  ;;  %3509 = vmatpush1.bf16.msra.mxu1 %v5164_v27  ;;  %v1686_v38 = vmax.f32 %v4898_v25, %v1670_v32  ;;  %v5235_v25 = vld [vmem:[#allocation7 + $0x544] ss:$16 sps:$4 sm:$0xff]   ;;  %v5238_v26 = vld [vmem:[#allocation7 + $0x54c] ss:$16 sps:$4 sm:$0xff]  }
 0x1de   :  { %v1693_v36 = vmax.f32 %v4899_v29, %v1677_v34  ;;  %3510 = vmatprep.subr.bf16.mxu1 %v5172_v31  ;;  %v5233_v27 = vld [vmem:[#allocation7 + $0x540] ss:$16 sps:$4 sm:$0xff]   ;;  %v5236_v28 = vld [vmem:[#allocation7 + $0x548] ss:$16 sps:$4 sm:$0xff]   ;;  %v5241_v29 = vld [vmem:[#allocation7 + $0x564] ss:$16 sps:$4 sm:$0xff]  }
 0x1df   :  { %v1694_v39 = vmax.f32 %v4900_v33, %v1678_v8  ;;  %v5244_v30 = vld [vmem:[#allocation7 + $0x56c] ss:$16 sps:$4 sm:$0xff]   ;;  %v5239_v31 = vld [vmem:[#allocation7 + $0x560] ss:$16 sps:$4 sm:$0xff]   ;;  %v5242_v32 = vld [vmem:[#allocation7 + $0x568] ss:$16 sps:$4 sm:$0xff]  }
 0x1e0   :  { %v1701_v40 = vpack.c.bf16 %v1693_v36, %v1685_v41  ;;  %v5247_v33 = vld [vmem:[#allocation7 + $0x584] ss:$16 sps:$4 sm:$0xff]   ;;  %v5250_v34 = vld [vmem:[#allocation7 + $0x58c] ss:$16 sps:$4 sm:$0xff]   ;;  %v5245_v8 = vld [vmem:[#allocation7 + $0x580] ss:$16 sps:$4 sm:$0xff]  }
 0x1e1   :  { %3511 = vmatpush1.bf16.msra.mxu1 %v5170_v35  ;;  %v1702_v42 = vpack.c.bf16 %v1694_v39, %v1686_v38  ;;  %v5248_v35 = vld [vmem:[#allocation7 + $0x588] ss:$16 sps:$4 sm:$0xff]   ;;  %v5253_v41 = vld [vmem:[#allocation7 + $0x5a4] ss:$16 sps:$4 sm:$0xff]   ;;  %v5256_v36 = vld [vmem:[#allocation7 + $0x5ac] ss:$16 sps:$4 sm:$0xff]  }
 0x1e2   :  { %3523 = vmatprep.subr.bf16.mxu1 %v5178_v37  ;;  %v5251_v37 = vld [vmem:[#allocation7 + $0x5a0] ss:$16 sps:$4 sm:$0xff]   ;;  %v5254_v38 = vld [vmem:[#allocation7 + $0x5a8] ss:$16 sps:$4 sm:$0xff]   ;;  %v5259_v39 = vld [vmem:[#allocation7 + $0x5c4] ss:$16 sps:$4 sm:$0xff]  }
 0x1e3   :  { %3340 = vmatprep.mubr.bf16.mxu0 %v1702_v42  ;;  %3512 = vmatprep.mubr.bf16.mxu1 %v1702_v42  ;;  %v5257_v42 = vld [vmem:[#allocation7 + $0x5c0] ss:$16 sps:$4 sm:$0xff]  }
 0x1e4   :  { %3341 = vmatmul.mubr.bf16.vlgmr.msra.gmra.mrb[8].mxu0 %v1701_v40  ;;  %3513 = vmatmul.mubr.bf16.vlgmr.msra.gmra.mrb[12].mxu1 %v1701_v40  ;;  %v5262_v40 = vld [vmem:[#allocation7 + $0x5cc] ss:$16 sps:$4 sm:$0xff]  }
 0x1e5   :  { %3352 = vmatpush1.bf16.msra.mxu0 %v5173_v1  ;;  %3524 = vmatpush1.bf16.msra.mxu1 %v5176_v43  ;;  %v5260_v1 = vld [vmem:[#allocation7 + $0x5c8] ss:$16 sps:$4 sm:$0xff]   ;;  %v5265_v43 = vld [vmem:[#allocation7 + $0x5e4] ss:$16 sps:$4 sm:$0xff]  }
 0x1e6   :  { %3353 = vmatprep.subr.bf16.mxu0 %v5181_v44  ;;  %3525 = vmatprep.subr.bf16.mxu1 %v5184_v45  ;;  %v5268_v44 = vld [vmem:[#allocation7 + $0x5ec] ss:$16 sps:$4 sm:$0xff]   ;;  %v5263_v45 = vld [vmem:[#allocation7 + $0x5e0] ss:$16 sps:$4 sm:$0xff]  }
 0x1e7   :  { %3383 = vmatprep.mubr.bf16.mxu0 %v5784_v6  ;;  %3555 = vmatprep.mubr.bf16.mxu1 %v5784_v6  ;;  %v5209_v6 = vld [vmem:[#allocation7 + $0x4c0] ss:$16 sps:$4 sm:$0xff]  }
 0x1e9   :  { %3354 = vmatpush1.bf16.msra.mxu0 %v5179_v20  ;;  %3526 = vmatpush1.bf16.msra.mxu1 %v5182_v46  ;;  %v5266_v20 = vld [vmem:[#allocation7 + $0x5e8] ss:$16 sps:$4 sm:$0xff]   ;;  %v5271_v46 = vld [vmem:[#allocation7 + $0x604] ss:$16 sps:$4 sm:$0xff]  }
 0x1ea   :  { %3355 = vmatprep.subr.bf16.mxu0 %v5187_v47  ;;  %3527 = vmatprep.subr.bf16.mxu1 %v5190_v48  ;;  %v5274_v47 = vld [vmem:[#allocation7 + $0x60c] ss:$16 sps:$4 sm:$0xff]   ;;  %v5269_v48 = vld [vmem:[#allocation7 + $0x600] ss:$16 sps:$4 sm:$0xff]  }
 0x1ed   :  { %3356 = vmatpush1.bf16.msra.mxu0 %v5185_v49  ;;  %3528 = vmatpush1.bf16.msra.mxu1 %v5188_v50  ;;  %v5272_v49 = vld [vmem:[#allocation7 + $0x608] ss:$16 sps:$4 sm:$0xff]   ;;  %v5277_v50 = vld [vmem:[#allocation7 + $0x624] ss:$16 sps:$4 sm:$0xff]  }
 0x1ee   :  { %3357 = vmatprep.subr.bf16.mxu0 %v5193_v51  ;;  %3529 = vmatprep.subr.bf16.mxu1 %v5196_v52  ;;  %v5280_v51 = vld [vmem:[#allocation7 + $0x62c] ss:$16 sps:$4 sm:$0xff]   ;;  %v5275_v52 = vld [vmem:[#allocation7 + $0x620] ss:$16 sps:$4 sm:$0xff]  }
 0x1f1   :  { %3358 = vmatpush1.bf16.msra.mxu0 %v5191_v53  ;;  %3530 = vmatpush1.bf16.msra.mxu1 %v5194_v54  ;;  %v5278_v53 = vld [vmem:[#allocation7 + $0x628] ss:$16 sps:$4 sm:$0xff]   ;;  %v5283_v54 = vld [vmem:[#allocation7 + $0x644] ss:$16 sps:$4 sm:$0xff]  }
 0x1f2   :  { %3359 = vmatprep.subr.bf16.mxu0 %v5199_v55  ;;  %3531 = vmatprep.subr.bf16.mxu1 %v5202_v56  ;;  %v5286_v55 = vld [vmem:[#allocation7 + $0x64c] ss:$16 sps:$4 sm:$0xff]   ;;  %v5281_v56 = vld [vmem:[#allocation7 + $0x640] ss:$16 sps:$4 sm:$0xff]  }
 0x1f5   :  { %3360 = vmatpush1.bf16.msra.mxu0 %v5197_v57  ;;  %3532 = vmatpush1.bf16.msra.mxu1 %v5200_v58  ;;  %v5284_v57 = vld [vmem:[#allocation7 + $0x648] ss:$16 sps:$4 sm:$0xff]   ;;  %v5289_v58 = vld [vmem:[#allocation7 + $0x664] ss:$16 sps:$4 sm:$0xff]  }
 0x1f6   :  { %3361 = vmatprep.subr.bf16.mxu0 %v5205_v59  ;;  %3533 = vmatprep.subr.bf16.mxu1 %v5208_v60  ;;  %v5292_v59 = vld [vmem:[#allocation7 + $0x66c] ss:$16 sps:$4 sm:$0xff]   ;;  %v5287_v60 = vld [vmem:[#allocation7 + $0x660] ss:$16 sps:$4 sm:$0xff]  }
 0x1f9   :  { %3362 = vmatpush1.bf16.msra.mxu0 %v5203_v61  ;;  %3534 = vmatpush1.bf16.msra.mxu1 %v5206_v62  ;;  %v5295_v61 = vld [vmem:[#allocation7 + $0x684] ss:$16 sps:$4 sm:$0xff]   ;;  %v5298_v62 = vld [vmem:[#allocation7 + $0x68c] ss:$16 sps:$4 sm:$0xff]  }
 0x1fa   :  { %3363 = vmatprep.subr.bf16.mxu0 %v5211_v0  ;;  %3535 = vmatprep.subr.bf16.mxu1 %v5214_v2  ;;  %v333_v0 = vsub.s32 6, %v5757_v63  ;;  %v5293_v2 = vld [vmem:[#allocation7 + $0x680] ss:$16 sps:$4 sm:$0xff]  }
 0x1fd   :  { %3364 = vmatpush1.bf16.msra.mxu0 %v5209_v6  ;;  %3536 = vmatpush1.bf16.msra.mxu1 %v5212_v7  ;;  %v5296_v6 = vld [vmem:[#allocation7 + $0x688] ss:$16 sps:$4 sm:$0xff]   ;;  %v337_v7 = vsub.s32 7, %v5757_v63 }
 0x1fe   :  { %3365 = vmatprep.subr.bf16.mxu0 %v5217_v10  ;;  %3537 = vmatprep.subr.bf16.mxu1 %v5220_v11  ;;  %v5301_v10 = vld [vmem:[#allocation7 + $0x6a4] ss:$16 sps:$4 sm:$0xff]   ;;  %v5304_v11 = vld [vmem:[#allocation7 + $0x6ac] ss:$16 sps:$4 sm:$0xff]  }
 0x201   :  { %3366 = vmatpush1.bf16.msra.mxu0 %v5215_v12  ;;  %3538 = vmatpush1.bf16.msra.mxu1 %v5218_v14  ;;  %v334_v12 = vrot.slane %v5765_v4, %v333_v0  ;;  %v5299_v14 = vld [vmem:[#allocation7 + $0x6a0] ss:$16 sps:$4 sm:$0xff]   ;;  %v5350_v0 = vld [vmem:[#allocation7 + $0x7a8] ss:$16 sps:$4 sm:$0xff]  }
 0x202   :  { %3367 = vmatprep.subr.bf16.mxu0 %v5223_v16  ;;  %3539 = vmatprep.subr.bf16.mxu1 %v5226_v17  ;;  %v338_v16 = vrot.slane %v5765_v4, %v337_v7  ;;  %v5302_v17 = vld [vmem:[#allocation7 + $0x6a8] ss:$16 sps:$4 sm:$0xff]   ;;  %v5316_v4 = vld [vmem:[#allocation7 + $0x6ec] ss:$16 sps:$4 sm:$0xff]   ;;  %v5353_v7 = vld [vmem:[#allocation7 + $0x7c0] ss:$16 sps:$4 sm:$0xff]  }
 0x205   :  { %3368 = vmatpush1.bf16.msra.mxu0 %v5221_v18  ;;  %3540 = vmatpush1.bf16.msra.mxu1 %v5224_v19  ;;  %v5307_v18 = vld [vmem:[#allocation7 + $0x6c4] ss:$16 sps:$4 sm:$0xff]   ;;  %v5310_v19 = vld [vmem:[#allocation7 + $0x6cc] ss:$16 sps:$4 sm:$0xff]  }
 0x206   :  { %3369 = vmatprep.subr.bf16.mxu0 %v5229_v21  ;;  %3541 = vmatprep.subr.bf16.mxu1 %v5232_v22 }
 0x209   :  { %3370 = vmatpush1.bf16.msra.mxu0 %v5227_v23  ;;  %3542 = vmatpush1.bf16.msra.mxu1 %v5230_v24  ;;  %v5305_v24 = vld [vmem:[#allocation7 + $0x6c0] ss:$16 sps:$4 sm:$0xff]  }
 0x20a   :  { %3371 = vmatprep.subr.bf16.mxu0 %v5235_v25  ;;  %3543 = vmatprep.subr.bf16.mxu1 %v5238_v26 }
 0x20d   :  { %3372 = vmatpush1.bf16.msra.mxu0 %v5233_v27  ;;  %3544 = vmatpush1.bf16.msra.mxu1 %v5236_v28  ;;  %v5308_v27 = vld [vmem:[#allocation7 + $0x6c8] ss:$16 sps:$4 sm:$0xff]   ;;  %v5313_v28 = vld [vmem:[#allocation7 + $0x6e4] ss:$16 sps:$4 sm:$0xff]  }
 0x20e   :  { %3373 = vmatprep.subr.bf16.mxu0 %v5241_v29  ;;  %3545 = vmatprep.subr.bf16.mxu1 %v5244_v30 }
 0x211   :  { %3374 = vmatpush1.bf16.msra.mxu0 %v5239_v31  ;;  %3546 = vmatpush1.bf16.msra.mxu1 %v5242_v32 }
 0x212   :  { %3375 = vmatprep.subr.bf16.mxu0 %v5247_v33  ;;  %3547 = vmatprep.subr.bf16.mxu1 %v5250_v34 }
 0x215   :  { %3376 = vmatpush1.bf16.msra.mxu0 %v5245_v8  ;;  %3548 = vmatpush1.bf16.msra.mxu1 %v5248_v35  ;;  %v5311_v35 = vld [vmem:[#allocation7 + $0x6e0] ss:$16 sps:$4 sm:$0xff]  }
 0x216   :  { %3377 = vmatprep.subr.bf16.mxu0 %v5253_v41  ;;  %3549 = vmatprep.subr.bf16.mxu1 %v5256_v36  ;;  %v5314_v41 = vld [vmem:[#allocation7 + $0x6e8] ss:$16 sps:$4 sm:$0xff]  }
 0x219   :  { %3378 = vmatpush1.bf16.msra.mxu0 %v5251_v37  ;;  %3550 = vmatpush1.bf16.msra.mxu1 %v5254_v38  ;;  %v5319_v38 = vld [vmem:[#allocation7 + $0x704] ss:$16 sps:$4 sm:$0xff]  }
 0x21a   :  { %3379 = vmatprep.subr.bf16.mxu0 %v5259_v39  ;;  %3551 = vmatprep.subr.bf16.mxu1 %v5262_v40  ;;  %v5322_v39 = vld [vmem:[#allocation7 + $0x70c] ss:$16 sps:$4 sm:$0xff]  }
 0x21d   :  { %3380 = vmatpush1.bf16.msra.mxu0 %v5257_v42  ;;  %3552 = vmatpush1.bf16.msra.mxu1 %v5260_v1 }
 0x21e   :  { %3381 = vmatprep.subr.bf16.mxu0 %v5265_v43  ;;  %3553 = vmatprep.subr.bf16.mxu1 %v5268_v44  ;;  %v5317_v43 = vld [vmem:[#allocation7 + $0x700] ss:$16 sps:$4 sm:$0xff]  }
 0x221   :  { %3382 = vmatpush1.bf16.msra.mxu0 %v5263_v45  ;;  %3554 = vmatpush1.bf16.msra.mxu1 %v5266_v20  ;;  %v5320_v45 = vld [vmem:[#allocation7 + $0x708] ss:$16 sps:$4 sm:$0xff]   ;;  %v5325_v20 = vld [vmem:[#allocation7 + $0x724] ss:$16 sps:$4 sm:$0xff]  }
 0x222   :  { %3394 = vmatprep.subr.bf16.mxu0 %v5271_v46  ;;  %3566 = vmatprep.subr.bf16.mxu1 %v5274_v47  ;;  %v5328_v46 = vld [vmem:[#allocation7 + $0x72c] ss:$16 sps:$4 sm:$0xff]   ;;  %v5323_v47 = vld [vmem:[#allocation7 + $0x720] ss:$16 sps:$4 sm:$0xff]  }
 0x224   :  { %3384 = vmatmul.mubr.bf16.vlgmr.msra.gmra.mrb[8].mxu0 %v5782_v9  ;;  %3556 = vmatmul.mubr.bf16.vlgmr.msra.gmra.mrb[12].mxu1 %v5782_v9  ;;  %v5290_v9 = vld [vmem:[#allocation7 + $0x668] ss:$16 sps:$4 sm:$0xff]  }
 0x225   :  { %3395 = vmatpush1.bf16.msra.mxu0 %v5269_v48  ;;  %3567 = vmatpush1.bf16.msra.mxu1 %v5272_v49  ;;  %v5326_v48 = vld [vmem:[#allocation7 + $0x728] ss:$16 sps:$4 sm:$0xff]   ;;  %v5331_v49 = vld [vmem:[#allocation7 + $0x744] ss:$16 sps:$4 sm:$0xff]  }
 0x226   :  { %3396 = vmatprep.subr.bf16.mxu0 %v5277_v50  ;;  %3568 = vmatprep.subr.bf16.mxu1 %v5280_v51  ;;  %v5334_v50 = vld [vmem:[#allocation7 + $0x74c] ss:$16 sps:$4 sm:$0xff]   ;;  %v5329_v51 = vld [vmem:[#allocation7 + $0x740] ss:$16 sps:$4 sm:$0xff]  }
 0x229   :  { %3397 = vmatpush1.bf16.msra.mxu0 %v5275_v52  ;;  %3569 = vmatpush1.bf16.msra.mxu1 %v5278_v53  ;;  %v5332_v52 = vld [vmem:[#allocation7 + $0x748] ss:$16 sps:$4 sm:$0xff]   ;;  %v5337_v53 = vld [vmem:[#allocation7 + $0x764] ss:$16 sps:$4 sm:$0xff]  }
 0x22a   :  { %3398 = vmatprep.subr.bf16.mxu0 %v5283_v54  ;;  %3570 = vmatprep.subr.bf16.mxu1 %v5286_v55  ;;  %v5340_v54 = vld [vmem:[#allocation7 + $0x76c] ss:$16 sps:$4 sm:$0xff]   ;;  %v5335_v55 = vld [vmem:[#allocation7 + $0x760] ss:$16 sps:$4 sm:$0xff]  }
 0x22d   :  { %3399 = vmatpush1.bf16.msra.mxu0 %v5281_v56  ;;  %3571 = vmatpush1.bf16.msra.mxu1 %v5284_v57  ;;  %v5338_v56 = vld [vmem:[#allocation7 + $0x768] ss:$16 sps:$4 sm:$0xff]   ;;  %v5343_v57 = vld [vmem:[#allocation7 + $0x784] ss:$16 sps:$4 sm:$0xff]  }
 0x22e   :  { %3400 = vmatprep.subr.bf16.mxu0 %v5289_v58  ;;  %3572 = vmatprep.subr.bf16.mxu1 %v5292_v59  ;;  %v5346_v58 = vld [vmem:[#allocation7 + $0x78c] ss:$16 sps:$4 sm:$0xff]   ;;  %v5341_v59 = vld [vmem:[#allocation7 + $0x780] ss:$16 sps:$4 sm:$0xff]  }
 0x231   :  { %3401 = vmatpush1.bf16.msra.mxu0 %v5287_v60  ;;  %3573 = vmatpush1.bf16.msra.mxu1 %v5290_v9  ;;  %v5344_v60 = vld [vmem:[#allocation7 + $0x788] ss:$16 sps:$4 sm:$0xff]   ;;  %v5349_v9 = vld [vmem:[#allocation7 + $0x7a4] ss:$16 sps:$4 sm:$0xff]  }
 0x232   :  { %3402 = vmatprep.subr.bf16.mxu0 %v5295_v61  ;;  %3574 = vmatprep.subr.bf16.mxu1 %v5298_v62  ;;  %v5352_v61 = vld [vmem:[#allocation7 + $0x7ac] ss:$16 sps:$4 sm:$0xff]   ;;  %v5347_v62 = vld [vmem:[#allocation7 + $0x7a0] ss:$16 sps:$4 sm:$0xff]  }
 0x235   :  { %3403 = vmatpush1.bf16.msra.mxu0 %v5293_v2  ;;  %3575 = vmatpush1.bf16.msra.mxu1 %v5296_v6  ;;  %v5355_v2 = vld [vmem:[#allocation7 + $0x7c4] ss:$16 sps:$4 sm:$0xff]   ;;  %v5358_v6 = vld [vmem:[#allocation7 + $0x7cc] ss:$16 sps:$4 sm:$0xff]  }
 0x236   :  { %3404 = vmatprep.subr.bf16.mxu0 %v5301_v10  ;;  %3576 = vmatprep.subr.bf16.mxu1 %v5304_v11  ;;  %v5356_v10 = vld [vmem:[#allocation7 + $0x7c8] ss:$16 sps:$4 sm:$0xff]   ;;  %v5361_v11 = vld [vmem:[#allocation7 + $0x7e4] ss:$16 sps:$4 sm:$0xff]  }
 0x237   :  { %v1658_v21 = vpop.f32.mrb[8].mxu1 }
 0x238   :  { %v4905_v22 = vadd.f32 %v1658_v21, %v334_v12  ;;  %v1660_v23 = vpop.f32.mrb[9].mxu1  ;;  %v5368_v21 = vld [vmem:[#allocation8 + $0x10] ss:$8 sps:$4 sm:$0xff]  }
 0x239   :  { %v4906_v25 = vadd.f32 %v1660_v23, %v338_v16  ;;  %3405 = vmatpush1.bf16.msra.mxu0 %v5299_v14  ;;  %v1662_v26 = vpop.f32.mrb[10].mxu1  ;;  %3577 = vmatpush1.bf16.msra.mxu1 %v5302_v17  ;;  %v5359_v14 = vld [vmem:[#allocation7 + $0x7e0] ss:$16 sps:$4 sm:$0xff]   ;;  %v5367_v17 = vld [vmem:[#allocation8 + $0x4] ss:$8 sps:$4 sm:$0xff]  }
 0x23a   :  { %v1673_v29 = vmul.f32 0.01, %v4905_v22  ;;  %v4907_v30 = vadd.f32 %v1662_v26, %v334_v12  ;;  %v1664_v31 = vpop.f32.mrb[11].mxu1  ;;  %3406 = vmatprep.subr.bf16.mxu0 %v5307_v18  ;;  %3578 = vmatprep.subr.bf16.mxu1 %v5310_v19  ;;  %v5364_v12 = vld [vmem:[#allocation7 + $0x7ec] ss:$16 sps:$4 sm:$0xff]  }
 0x23b   :  { %v1674_v32 = vmul.f32 0.01, %v4906_v25  ;;  %v4908_v33 = vadd.f32 %v1664_v31, %v338_v16  ;;  %v5362_v16 = vld [vmem:[#allocation7 + $0x7e8] ss:$16 sps:$4 sm:$0xff]   ;;  %v5370_v19 = vld [vmem:[#allocation8 + $0x14] ss:$8 sps:$4 sm:$0xff]  }
 0x23c   :  { %v1681_v34 = vmul.f32 0.01, %v4907_v30  ;;  %v1689_v36 = vmax.f32 %v4905_v22, %v1673_v29  ;;  %v5365_v18 = vld [vmem:[#allocation8] ss:$8 sps:$4 sm:$0xff]   ;;  %v5373_v22 = vld [vmem:[#allocation8 + $0x24] ss:$8 sps:$4 sm:$0xff]  }
 0x23d   :  { %v1682_v8 = vmul.f32 0.01, %v4908_v33  ;;  %3407 = vmatpush1.bf16.msra.mxu0 %v5305_v24  ;;  %3579 = vmatpush1.bf16.msra.mxu1 %v5308_v27  ;;  %v1690_v40 = vmax.f32 %v4906_v25, %v1674_v32  ;;  %v5371_v23 = vld [vmem:[#allocation8 + $0x20] ss:$8 sps:$4 sm:$0xff]   ;;  %v5376_v24 = vld [vmem:[#allocation8 + $0x34] ss:$8 sps:$4 sm:$0xff]  }
 0x23e   :  { %v1697_v37 = vmax.f32 %v4907_v30, %v1681_v34  ;;  %3408 = vmatprep.subr.bf16.mxu0 %v5313_v28  ;;  %3580 = vmatprep.subr.bf16.mxu1 %v5316_v4  ;;  %v5374_v25 = vld [vmem:[#allocation8 + $0x30] ss:$8 sps:$4 sm:$0xff]   ;;  %v5379_v26 = vld [vmem:[#allocation8 + $0x44] ss:$8 sps:$4 sm:$0xff]   ;;  %v5377_v27 = vld [vmem:[#allocation8 + $0x40] ss:$8 sps:$4 sm:$0xff]  }
 0x23f   :  { %v1698_v42 = vmax.f32 %v4908_v33, %v1682_v8  ;;  %v5382_v28 = vld [vmem:[#allocation8 + $0x54] ss:$8 sps:$4 sm:$0xff]   ;;  %v5380_v29 = vld [vmem:[#allocation8 + $0x50] ss:$8 sps:$4 sm:$0xff]   ;;  %v5385_v30 = vld [vmem:[#allocation8 + $0x64] ss:$8 sps:$4 sm:$0xff]  }
 0x240   :  { %v5802_v1 = vpack.c.bf16 %v1697_v37, %v1689_v36  ;;  %v5383_v31 = vld [vmem:[#allocation8 + $0x60] ss:$8 sps:$4 sm:$0xff]   ;;  %v5388_v4 = vld [vmem:[#allocation8 + $0x74] ss:$8 sps:$4 sm:$0xff]   ;;  %v5386_v32 = vld [vmem:[#allocation8 + $0x70] ss:$8 sps:$4 sm:$0xff]  }
 0x241   :  { %3409 = vmatpush1.bf16.msra.mxu0 %v5311_v35  ;;  %3581 = vmatpush1.bf16.msra.mxu1 %v5314_v41  ;;  %v1706_v44 = vpack.c.bf16 %v1698_v42, %v1690_v40  ;;  %v5391_v33 = vld [vmem:[#allocation8 + $0x84] ss:$8 sps:$4 sm:$0xff]   ;;  %v5389_v34 = vld [vmem:[#allocation8 + $0x80] ss:$8 sps:$4 sm:$0xff]   ;;  %v5394_v8 = vld [vmem:[#allocation8 + $0x94] ss:$8 sps:$4 sm:$0xff]  }
 0x242   :  { %3410 = vmatprep.subr.bf16.mxu0 %v5319_v38  ;;  %3582 = vmatprep.subr.bf16.mxu1 %v5322_v39  ;;  %v5392_v35 = vld [vmem:[#allocation8 + $0x90] ss:$8 sps:$4 sm:$0xff]   ;;  %v5397_v41 = vld [vmem:[#allocation8 + $0xa4] ss:$8 sps:$4 sm:$0xff]   ;;  %v5395_v36 = vld [vmem:[#allocation8 + $0xa0] ss:$8 sps:$4 sm:$0xff]  }
 0x243   :  { %3426 = vmatprep.mubr.bf16.mxu0 %v1706_v44  ;;  %3598 = vmatprep.mubr.bf16.mxu1 %v1706_v44  ;;  %v5400_v37 = vld [vmem:[#allocation8 + $0xb4] ss:$8 sps:$4 sm:$0xff]   ;;  %v5398_v38 = vld [vmem:[#allocation8 + $0xb0] ss:$8 sps:$4 sm:$0xff]   ;;  %v5403_v39 = vld [vmem:[#allocation8 + $0xc4] ss:$8 sps:$4 sm:$0xff]  }
 0x244   :  { %v5401_v40 = vld [vmem:[#allocation8 + $0xc0] ss:$8 sps:$4 sm:$0xff]   ;;  %v5406_v42 = vld [vmem:[#allocation8 + $0xd4] ss:$8 sps:$4 sm:$0xff]  }
 0x245   :  { %3411 = vmatpush1.bf16.msra.mxu0 %v5317_v43  ;;  %3583 = vmatpush1.bf16.msra.mxu1 %v5320_v45  ;;  %v5409_v43 = vld [vmem:[#allocation8 + $0xe4] ss:$8 sps:$4 sm:$0xff]   ;;  %v5407_v44 = vld [vmem:[#allocation8 + $0xe0] ss:$8 sps:$4 sm:$0xff]   ;;  %v5412_v45 = vld [vmem:[#allocation8 + $0xf4] ss:$8 sps:$4 sm:$0xff]  }
 0x246   :  { %3412 = vmatprep.subr.bf16.mxu0 %v5325_v20  ;;  %3584 = vmatprep.subr.bf16.mxu1 %v5328_v46  ;;  %v5410_v20 = vld [vmem:[#allocation8 + $0xf0] ss:$8 sps:$4 sm:$0xff]   ;;  %v5415_v46 = vld [vmem:[#allocation8 + $0x104] ss:$8 sps:$4 sm:$0xff]  }
 0x249   :  { %3413 = vmatpush1.bf16.msra.mxu0 %v5323_v47  ;;  %3585 = vmatpush1.bf16.msra.mxu1 %v5326_v48  ;;  %v5461_v47 = vld [vmem:[#allocation10 + $0x40] sm:$0xff]  }
 0x24a   :  { %3414 = vmatprep.subr.bf16.mxu0 %v5331_v49  ;;  %3586 = vmatprep.subr.bf16.mxu1 %v5334_v50  ;;  %v5462_v48 = vld [vmem:[#allocation10] sm:$0xff]   ;;  %v5463_v49 = vld [vmem:[#allocation10 + $0x48] sm:$0xff]  }
 0x24b   :  { %v5464_v50 = vld [vmem:[#allocation10 + $0x8] sm:$0xff]  }
 0x24d   :  { %3415 = vmatpush1.bf16.msra.mxu0 %v5329_v51  ;;  %3587 = vmatpush1.bf16.msra.mxu1 %v5332_v52  ;;  %v5465_v51 = vld [vmem:[#allocation10 + $0x50] sm:$0xff]  }
 0x24e   :  { %3416 = vmatprep.subr.bf16.mxu0 %v5337_v53  ;;  %3588 = vmatprep.subr.bf16.mxu1 %v5340_v54  ;;  %v5466_v52 = vld [vmem:[#allocation10 + $0x10] sm:$0xff]   ;;  %v5467_v53 = vld [vmem:[#allocation10 + $0x58] sm:$0xff]  }
 0x24f   :  { %v5468_v54 = vld [vmem:[#allocation10 + $0x18] sm:$0xff]  }
 0x251   :  { %3417 = vmatpush1.bf16.msra.mxu0 %v5335_v55  ;;  %3589 = vmatpush1.bf16.msra.mxu1 %v5338_v56  ;;  %v5469_v55 = vld [vmem:[#allocation10 + $0x60] sm:$0xff]  }
 0x252   :  { %3418 = vmatprep.subr.bf16.mxu0 %v5343_v57  ;;  %3590 = vmatprep.subr.bf16.mxu1 %v5346_v58  ;;  %v5470_v56 = vld [vmem:[#allocation10 + $0x20] sm:$0xff]  }
 0x253   :  { %v1963_v57 = vld [vmem:[%s5839_s4] sm:$0xf] }
 0x254   :  { %v1968_v58 = vrot.slane %v1963_v57, %v5760_v3 }
 0x255   :  { %3419 = vmatpush1.bf16.msra.mxu0 %v5341_v59  ;;  %3591 = vmatpush1.bf16.msra.mxu1 %v5344_v60  ;;  %v1976_v59 = vrot.slane %v1963_v57, %v317_v13  ;;  %v1972_v60 = vrot.slane %v1963_v57, %v5768_v5 }
 0x256   :  { %3420 = vmatprep.subr.bf16.mxu0 %v5349_v9  ;;  %3592 = vmatprep.subr.bf16.mxu1 %v5352_v61  ;;  %v1980_v9 = vrot.slane %v1963_v57, %v321_v15  ;;  %v5448_v57 = vld [vmem:[#allocation8 + $0x1b4] ss:$8 sps:$4 sm:$0xff]  }
 0x259   :  { %3421 = vmatpush1.bf16.msra.mxu0 %v5347_v62  ;;  %3593 = vmatpush1.bf16.msra.mxu1 %v5350_v0 }
 0x25a   :  { %3422 = vmatprep.subr.bf16.mxu0 %v5355_v2  ;;  %3594 = vmatprep.subr.bf16.mxu1 %v5358_v6 }
 0x25d   :  { %3423 = vmatpush1.bf16.msra.mxu0 %v5353_v7  ;;  %3595 = vmatpush1.bf16.msra.mxu1 %v5356_v10 }
 0x25e   :  { %3424 = vmatprep.subr.bf16.mxu0 %v5361_v11  ;;  %3596 = vmatprep.subr.bf16.mxu1 %v5364_v12 }
 0x261   :  { %3425 = vmatpush1.bf16.msra.mxu0 %v5359_v14  ;;  %3597 = vmatpush1.bf16.msra.mxu1 %v5362_v16 }
 0x262   :  { %4025 = vmatprep.subr.bf16.mxu0 %v5367_v17  ;;  %4867 = vmatprep.subr.bf16.mxu1 %v5461_v47  ;;  %v5433_v47 = vld [vmem:[#allocation8 + $0x164] ss:$8 sps:$4 sm:$0xff]  }
 0x264   :  { %3427 = vmatmul.mubr.bf16.vlgmr.msra.gmra.mrb[8].mxu0 %v5802_v1  ;;  %3599 = vmatmul.mubr.bf16.vlgmr.msra.gmra.mrb[12].mxu1 %v5802_v1  ;;  %v5404_v1 = vld [vmem:[#allocation8 + $0xd0] ss:$8 sps:$4 sm:$0xff]  }
 0x265   :  { %4026 = vmatpush1.bf16.msra.mxu0 %v5365_v18  ;;  %4868 = vmatpush3.bf16.msra.mxu1 %v5462_v48  ;;  %v5431_v48 = vld [vmem:[#allocation8 + $0x160] ss:$8 sps:$4 sm:$0xff]  }
 0x266   :  { %4027 = vmatprep.subr.bf16.mxu0 %v5370_v19  ;;  %4869 = vmatprep.subr.bf16.mxu1 %v5463_v49  ;;  %v5436_v49 = vld [vmem:[#allocation8 + $0x174] ss:$8 sps:$4 sm:$0xff]  }
 0x269   :  { %4028 = vmatpush1.bf16.msra.mxu0 %v5368_v21  ;;  %4870 = vmatpush3.bf16.msra.mxu1 %v5464_v50  ;;  %v5434_v50 = vld [vmem:[#allocation8 + $0x170] ss:$8 sps:$4 sm:$0xff]  }
 0x26a   :  { %4029 = vmatprep.subr.bf16.mxu0 %v5373_v22  ;;  %4871 = vmatprep.subr.bf16.mxu1 %v5465_v51  ;;  %v5439_v51 = vld [vmem:[#allocation8 + $0x184] ss:$8 sps:$4 sm:$0xff]  }
 0x26d   :  { %4030 = vmatpush1.bf16.msra.mxu0 %v5371_v23  ;;  %4872 = vmatpush3.bf16.msra.mxu1 %v5466_v52  ;;  %v5437_v52 = vld [vmem:[#allocation8 + $0x180] ss:$8 sps:$4 sm:$0xff]  }
 0x26e   :  { %4031 = vmatprep.subr.bf16.mxu0 %v5376_v24  ;;  %4873 = vmatprep.subr.bf16.mxu1 %v5467_v53  ;;  %v5442_v53 = vld [vmem:[#allocation8 + $0x194] ss:$8 sps:$4 sm:$0xff]  }
 0x271   :  { %4032 = vmatpush1.bf16.msra.mxu0 %v5374_v25  ;;  %4874 = vmatpush3.bf16.msra.mxu1 %v5468_v54  ;;  %v5440_v54 = vld [vmem:[#allocation8 + $0x190] ss:$8 sps:$4 sm:$0xff]  }
 0x272   :  { %4033 = vmatprep.subr.bf16.mxu0 %v5379_v26  ;;  %4875 = vmatprep.subr.bf16.mxu1 %v5469_v55  ;;  %v5445_v55 = vld [vmem:[#allocation8 + $0x1a4] ss:$8 sps:$4 sm:$0xff]  }
 0x275   :  { %4034 = vmatpush1.bf16.msra.mxu0 %v5377_v27  ;;  %4876 = vmatpush3.bf16.msra.mxu1 %v5470_v56  ;;  %v5443_v56 = vld [vmem:[#allocation8 + $0x1a0] ss:$8 sps:$4 sm:$0xff]  }
 0x276   :  { %4035 = vmatprep.subr.bf16.mxu0 %v5382_v28 }
 0x279   :  { %4036 = vmatpush1.bf16.msra.mxu0 %v5380_v29 }
 0x27a   :  { %4037 = vmatprep.subr.bf16.mxu0 %v5385_v30 }
 0x27d   :  { %4038 = vmatpush1.bf16.msra.mxu0 %v5383_v31 }
 0x27e   :  { %4039 = vmatprep.subr.bf16.mxu0 %v5388_v4 }
 0x281   :  { %4040 = vmatpush1.bf16.msra.mxu0 %v5386_v32 }
 0x282   :  { %4041 = vmatprep.subr.bf16.mxu0 %v5391_v33 }
 0x285   :  { %4042 = vmatpush1.bf16.msra.mxu0 %v5389_v34 }
 0x286   :  { %4043 = vmatprep.subr.bf16.mxu0 %v5394_v8 }
 0x289   :  { %4044 = vmatpush1.bf16.msra.mxu0 %v5392_v35 }
 0x28a   :  { %4045 = vmatprep.subr.bf16.mxu0 %v5397_v41 }
 0x28d   :  { %4046 = vmatpush1.bf16.msra.mxu0 %v5395_v36  ;;  %v5413_v36 = vld [vmem:[#allocation8 + $0x100] ss:$8 sps:$4 sm:$0xff]  }
 0x28e   :  { %4047 = vmatprep.subr.bf16.mxu0 %v5400_v37 }
 0x291   :  { %4048 = vmatpush1.bf16.msra.mxu0 %v5398_v38  ;;  %v5418_v38 = vld [vmem:[#allocation8 + $0x114] ss:$8 sps:$4 sm:$0xff]  }
 0x292   :  { %4049 = vmatprep.subr.bf16.mxu0 %v5403_v39  ;;  %v5416_v39 = vld [vmem:[#allocation8 + $0x110] ss:$8 sps:$4 sm:$0xff]  }
 0x295   :  { %4050 = vmatpush1.bf16.msra.mxu0 %v5401_v40  ;;  %v5421_v40 = vld [vmem:[#allocation8 + $0x124] ss:$8 sps:$4 sm:$0xff]  }
 0x296   :  { %4051 = vmatprep.subr.bf16.mxu0 %v5406_v42  ;;  %v5419_v42 = vld [vmem:[#allocation8 + $0x120] ss:$8 sps:$4 sm:$0xff]  }
 0x299   :  { %4052 = vmatpush1.bf16.msra.mxu0 %v5404_v1  ;;  %v5424_v1 = vld [vmem:[#allocation8 + $0x134] ss:$8 sps:$4 sm:$0xff]  }
 0x29a   :  { %4053 = vmatprep.subr.bf16.mxu0 %v5409_v43  ;;  %v5422_v43 = vld [vmem:[#allocation8 + $0x130] ss:$8 sps:$4 sm:$0xff]  }
 0x29d   :  { %4054 = vmatpush1.bf16.msra.mxu0 %v5407_v44  ;;  %v5427_v44 = vld [vmem:[#allocation8 + $0x144] ss:$8 sps:$4 sm:$0xff]  }
 0x29e   :  { %4055 = vmatprep.subr.bf16.mxu0 %v5412_v45  ;;  %v5425_v45 = vld [vmem:[#allocation8 + $0x140] ss:$8 sps:$4 sm:$0xff]  }
 0x2a1   :  { %4056 = vmatpush1.bf16.msra.mxu0 %v5410_v20  ;;  %v5430_v20 = vld [vmem:[#allocation8 + $0x154] ss:$8 sps:$4 sm:$0xff]  }
 0x2a2   :  { %4068 = vmatprep.subr.bf16.mxu0 %v5415_v46  ;;  %v5428_v46 = vld [vmem:[#allocation8 + $0x150] ss:$8 sps:$4 sm:$0xff]  }
 0x337   :  { %v3428_v61 = vpop.f32.mrb[8].mxu0  ;;  %v3600_v62 = vpop.f32.mrb[12].mxu1 }
 0x338   :  { %v4909_v0 = vadd.f32 %v3428_v61, %v1968_v58  ;;  %v3430_v2 = vpop.f32.mrb[9].mxu0  ;;  %v4913_v6 = vadd.f32 %v3600_v62, %v1976_v59  ;;  %v3602_v7 = vpop.f32.mrb[13].mxu1  ;;  %v5452_v61 = vld [vmem:[#allocation8 + $0x1d0] ss:$8 sps:$4 sm:$0xff]   ;;  %v5457_v62 = vld [vmem:[#allocation8 + $0x1e4] ss:$8 sps:$4 sm:$0xff]  }
 0x339   :  { %v4910_v10 = vadd.f32 %v3430_v2, %v1972_v60  ;;  %v3432_v11 = vpop.f32.mrb[10].mxu0  ;;  %v4914_v12 = vadd.f32 %v3602_v7, %v1980_v9  ;;  %v3604_v14 = vpop.f32.mrb[14].mxu1  ;;  %v5460_v2 = vld [vmem:[#allocation8 + $0x1f4] ss:$8 sps:$4 sm:$0xff]   ;;  %v5471_v7 = vld [vmem:[#allocation10 + $0x68] sm:$0xff]  }
 0x33a   :  { %v3609_v16 = vmul.f32 0.01, %v4909_v0  ;;  %v3611_v17 = vmul.f32 0.01, %v4913_v6  ;;  %v4911_v18 = vadd.f32 %v3432_v11, %v1968_v58  ;;  %v3434_v19 = vpop.f32.mrb[11].mxu0  ;;  %v4915_v13 = vadd.f32 %v3604_v14, %v1976_v59  ;;  %v3606_v21 = vpop.f32.mrb[15].mxu1  ;;  %4877 = vmatprep.subr.bf16.mxu1 %v5471_v7 }
 0x33b   :  { %v3610_v22 = vmul.f32 0.01, %v4910_v10  ;;  %v3612_v23 = vmul.f32 0.01, %v4914_v12  ;;  %v4912_v63 = vadd.f32 %v3434_v19, %v1972_v60  ;;  %v4916_v15 = vadd.f32 %v3606_v21, %v1980_v9  ;;  %v5446_v58 = vld [vmem:[#allocation8 + $0x1b0] ss:$8 sps:$4 sm:$0xff]  }
 0x33c   :  { %v3613_v24 = vmul.f32 0.01, %v4911_v18  ;;  %v3615_v25 = vmul.f32 0.01, %v4915_v13  ;;  %v3617_v28 = vmax.f32 %v4909_v0, %v3609_v16  ;;  %v3619_v29 = vmax.f32 %v4913_v6, %v3611_v17  ;;  %v5451_v59 = vld [vmem:[#allocation8 + $0x1c4] ss:$8 sps:$4 sm:$0xff]  }
 0x33d   :  { %v3614_v26 = vmul.f32 0.01, %v4912_v63  ;;  %v3616_v27 = vmul.f32 0.01, %v4916_v15  ;;  %v3618_v4 = vmax.f32 %v4910_v10, %v3610_v22  ;;  %v3620_v32 = vmax.f32 %v4914_v12, %v3612_v23  ;;  %v5449_v60 = vld [vmem:[#allocation8 + $0x1c0] ss:$8 sps:$4 sm:$0xff]  }
 0x33e   :  { %v3621_v30 = vmax.f32 %v4911_v18, %v3613_v24  ;;  %v3623_v31 = vmax.f32 %v4915_v13, %v3615_v25  ;;  %v5454_v9 = vld [vmem:[#allocation8 + $0x1d4] ss:$8 sps:$4 sm:$0xff]   ;;  %v5455_v0 = vld [vmem:[#allocation8 + $0x1e0] ss:$8 sps:$4 sm:$0xff]   ;;  %v5458_v6 = vld [vmem:[#allocation8 + $0x1f0] ss:$8 sps:$4 sm:$0xff]  }
 0x33f   :  { %v3622_v33 = vmax.f32 %v4912_v63, %v3614_v26  ;;  %v3624_v34 = vmax.f32 %v4916_v15, %v3616_v27  ;;  %v5472_v10 = vld [vmem:[#allocation10 + $0x28] sm:$0xff]   ;;  %v5473_v11 = vld [vmem:[#allocation10 + $0x70] sm:$0xff]   ;;  %v5475_v14 = vld [vmem:[#allocation10 + $0x78] sm:$0xff]  }
 0x340   :  { %v3625_v8 = vpack.c.bf16 %v3621_v30, %v3617_v28  ;;  %v5815_v35 = vpack.c.bf16 %v3623_v31, %v3619_v29  ;;  %4878 = vmatpush3.bf16.msra.mxu1 %v5472_v10  ;;  %v5474_v12 = vld [vmem:[#allocation10 + $0x30] sm:$0xff]   ;;  %v5476_v16 = vld [vmem:[#allocation10 + $0x38] sm:$0xff]   ;;  %v3693_v17 = vld [vmem:[%s5841_s6] sm:$0x3] }
 0x341   :  { %v3626_v41 = vpack.c.bf16 %v3622_v33, %v3618_v4  ;;  %v3628_v37 = vpack.c.bf16 %v3624_v34, %v3620_v32  ;;  %4879 = vmatprep.subr.bf16.mxu1 %v5473_v11  ;;  %v3698_v18 = vrot.slane %v3693_v17, %v5760_v3  ;;  %v3702_v19 = vrot.slane %v3693_v17, %v5768_v5  ;;  %v4848_v34 = vld [vmem:[%s5843_s8] ss:$0 sm:$0xff] }
 0x343   :  { %4057 = vmatprep.mubr.bf16.mxu0 %v3626_v41 }
 0x344   :  { %4058 = vmatmul.mubr.bf16.vlgmr.msra.gmra.mrb[12].mxu0 %v3625_v8  ;;  %4880 = vmatpush3.bf16.msra.mxu1 %v5474_v12 }
 0x345   :  { %4069 = vmatpush1.bf16.msra.mxu0 %v5413_v36  ;;  %4100 = vmatprep.mubr.bf16.mxu0 %v3628_v37 }
 0x346   :  { %4070 = vmatprep.subr.bf16.mxu0 %v5418_v38  ;;  %4881 = vmatprep.subr.bf16.mxu1 %v5475_v14 }
 0x348   :  { %4882 = vmatpush3.bf16.msra.mxu1 %v5476_v16 }
 0x349   :  { %4071 = vmatpush1.bf16.msra.mxu0 %v5416_v39 }
 0x34a   :  { %4072 = vmatprep.subr.bf16.mxu0 %v5421_v40 }
 0x34d   :  { %4073 = vmatpush1.bf16.msra.mxu0 %v5419_v42  ;;  %v4865_v42 = vld [vmem:[%s5844_s9] ss:$0 sm:$0xff] }
 0x34e   :  { %4074 = vmatprep.subr.bf16.mxu0 %v5424_v1 }
 0x351   :  { %4075 = vmatpush1.bf16.msra.mxu0 %v5422_v43 }
 0x352   :  { %4076 = vmatprep.subr.bf16.mxu0 %v5427_v44 }
 0x355   :  { %4077 = vmatpush1.bf16.msra.mxu0 %v5425_v45 }
 0x356   :  { %4078 = vmatprep.subr.bf16.mxu0 %v5430_v20 }
 0x359   :  { %4079 = vmatpush1.bf16.msra.mxu0 %v5428_v46  ;;  %v4866_v46 = vld [vmem:[#allocation2] ss:$0 sm:$0xff] }
 0x35a   :  { %4080 = vmatprep.subr.bf16.mxu0 %v5433_v47 }
 0x35d   :  { %4081 = vmatpush1.bf16.msra.mxu0 %v5431_v48 }
 0x35e   :  { %4082 = vmatprep.subr.bf16.mxu0 %v5436_v49 }
 0x361   :  { %4083 = vmatpush1.bf16.msra.mxu0 %v5434_v50 }
 0x362   :  { %4084 = vmatprep.subr.bf16.mxu0 %v5439_v51 }
 0x365   :  { %4085 = vmatpush1.bf16.msra.mxu0 %v5437_v52 }
 0x366   :  { %4086 = vmatprep.subr.bf16.mxu0 %v5442_v53 }
 0x369   :  { %4087 = vmatpush1.bf16.msra.mxu0 %v5440_v54 }
 0x36a   :  { %4088 = vmatprep.subr.bf16.mxu0 %v5445_v55 }
 0x36d   :  { %4089 = vmatpush1.bf16.msra.mxu0 %v5443_v56 }
 0x36e   :  { %4090 = vmatprep.subr.bf16.mxu0 %v5448_v57 }
 0x371   :  { %4091 = vmatpush1.bf16.msra.mxu0 %v5446_v58 }
 0x372   :  { %4092 = vmatprep.subr.bf16.mxu0 %v5451_v59 }
 0x375   :  { %4093 = vmatpush1.bf16.msra.mxu0 %v5449_v60 }
 0x376   :  { %4094 = vmatprep.subr.bf16.mxu0 %v5454_v9 }
 0x379   :  { %4095 = vmatpush1.bf16.msra.mxu0 %v5452_v61 }
 0x37a   :  { %4096 = vmatprep.subr.bf16.mxu0 %v5457_v62 }
 0x37d   :  { %4097 = vmatpush1.bf16.msra.mxu0 %v5455_v0 }
 0x37e   :  { %4098 = vmatprep.subr.bf16.mxu0 %v5460_v2 }
 0x381   :  { %4099 = vmatpush1.bf16.msra.mxu0 %v5458_v6 }
 0x384   :  { %4101 = vmatmul.mubr.bf16.vlgmr.msra.gmra.mrb[12].mxu0 %v5815_v35 }
 0x457   :  { %v4102_v13 = vpop.f32.mrb[12].mxu0 }
 0x458   :  { %v4917_v21 = vadd.f32 %v4102_v13, %v3698_v18  ;;  %v4104_v22 = vpop.f32.mrb[13].mxu0 }
 0x459   :  { %v4918_v23 = vadd.f32 %v4104_v22, %v3702_v19  ;;  %v4106_v63 = vpop.f32.mrb[14].mxu0 }
 0x45a   :  { %v4111_v15 = vmul.f32 0.01, %v4917_v21  ;;  %v4919_v24 = vadd.f32 %v4106_v63, %v3698_v18  ;;  %v4108_v25 = vpop.f32.mrb[15].mxu0 }
 0x45b   :  { %v4112_v26 = vmul.f32 0.01, %v4918_v23  ;;  %v4920_v27 = vadd.f32 %v4108_v25, %v3702_v19 }
 0x45c   :  { %v4113_v28 = vmul.f32 0.01, %v4919_v24  ;;  %v4115_v30 = vmax.f32 %v4917_v21, %v4111_v15 }
 0x45d   :  { %v4114_v29 = vmul.f32 0.01, %v4920_v27  ;;  %v4116_v4 = vmax.f32 %v4918_v23, %v4112_v26 }
 0x45e   :  { %v4117_v31 = vmax.f32 %v4919_v24, %v4113_v28 }
 0x45f   :  { %v4118_v32 = vmax.f32 %v4920_v27, %v4114_v29 }
 0x460   :  { %v4119_v33 = vpack.c.bf16 %v4117_v31, %v4115_v30 }
 0x461   :  { %v4120_v3 = vpack.c.bf16 %v4118_v32, %v4116_v4 }
 0x463   :  { %4288 = vmatprep.mubr.bf16.mxu1 %v4120_v3 }
 0x464   :  { %4289 = vmatmul.mubr.bf16.vlgmr.msra.gmra.mrb[16].mxu1 %v4119_v33 }
 0x537   :  { %v4883_v5 = vpop.f32.mrb[16].mxu1 }
 0x538   :  { %v4884_v8 = vpop.f32.mrb[17].mxu1 }
 0x539   :  { %v4885_v35 = vadd.f32 %v4884_v8, %v4883_v5  ;;  %v4886_v41 = vpop.f32.mrb[18].mxu1 }
 0x53a   :  { %v4887_v36 = vpop.f32.mrb[19].mxu1 }
 0x53b   :  { %v4291_v37 = vadd.f32 %v4885_v35, %v4848_v34  ;;  %v4888_v38 = vadd.f32 %v4887_v36, %v4886_v41 }
 0x53d   :  { %v4294_v39 = vadd.f32 %v4888_v38, %v4848_v34  ;;  %v4297_v40 = vmul.f32 0.01, %v4291_v37 }
 0x53f   :  { %v4298_v1 = vmul.f32 0.01, %v4294_v39  ;;  %v4299_v43 = vmax.f32 %v4291_v37, %v4297_v40 }
 0x541   :  { %v4308_v44 = vmul.f32 %v4865_v42, %v4299_v43  ;;  %v4300_v45 = vmax.f32 %v4294_v39, %v4298_v1 }
 0x543   :  { %4310 = vadd.xlane.f32.xlu0 %v4308_v44  ;;  %v4309_v20 = vmul.f32 %v4865_v42, %v4300_v45 }
 0x547   :  { %4312 = vadd.xlane.f32.xlu0 %v4309_v20 }
 0x5d0   :  { %v4311_v47 = vpop.xlane.xlu0 %4310 }
 0x5d1   :  { %v4321_v48 = vadd.f32 %v4866_v46, %v4311_v47 }
 0x5d3   :  { %4324 = vst.msk [vmem:[%s5846_s11] sm:$0xff] %vm4323_vm0, %v4321_v48 }
 0x5d4   :  { %v4313_v49 = vpop.xlane.xlu0 %4312 }
 0x5d5   :  { %v4322_v50 = vadd.f32 %v4866_v46, %v4313_v49 }
 0x5d7   :  { %4325 = vst.msk [vmem:[%s5846_s11 + $0x8] sm:$0xff] %vm4323_vm0, %v4322_v50 }
 0x5d8   :  { %4330 = vsyncpa [#allocation4], 1 }
 0x5d9   :  { %4331 = vsyncpa [#allocation6], 1 }
 0x5da   :  { %4332 = vsyncpa [#allocation9], 1 }

</bundles_post_ra>
